<compile_context>
chip_gen: v7x
topology: tpu7x:2x2x1
jax: 0.10.0
libtpu: 0.0.40
codegen_flags: <defaults>
</compile_context>

<pallas_src>
import math

import jax
import jax.numpy as jnp
import numpy as np
from jax.experimental import pallas as pl
from jax.experimental.pallas import tpu as pltpu


def _gaussian_1d(window_size: int, sigma: float) -> np.ndarray:
    # Mirrors utils/loss_utils.py::gaussian.
    g = np.array(
        [math.exp(-((x - window_size // 2) ** 2) / float(2 * sigma ** 2))
         for x in range(window_size)],
        dtype=np.float32,
    )
    return g / g.sum()


def _band_matrix(n: int, g: np.ndarray) -> np.ndarray:
    """Banded matrix M (n, n) with M[r, c] = g[c - r + P] (zero padding baked in).

    out = M @ x is the 1-D 'same' zero-padded cross-correlation of x with g
    along axis 0, identical to F.conv2d(padding=K//2) behaviour.
    """
    K = int(g.shape[0])
    P = K // 2
    m = np.zeros((n, n), dtype=np.float32)
    for r in range(n):
        for k in range(K):
            c = r + k - P
            if 0 <= c < n:
                m[r, c] = g[k]
    return m


def _vmem_capacity_bytes() -> int:
    try:
        return int(pltpu.get_tpu_info().vmem_capacity_bytes)
    except Exception:
        return 64 << 20  # conservative (v7x per-TC VMEM)


def _pick_block_planes(nc: int, hp: int, wp: int, vmem_budget: int) -> int:
    """Pick planes-per-step: fit the VMEM budget, prefer steps >= 2 and even."""
    plane_cost = 16 * hp * wp                       # 2 inputs x 2 pipeline bufs x 4B
    fixed_cost = 8 * (hp * hp + wp * wp) + 200 * hp * wp   # bands + scratches + temps
    avail = max(vmem_budget - fixed_cost, plane_cost)
    cap = int(max(1, min(16, avail // plane_cost, nc)))
    divisors = [d for d in range(1, nc + 1) if nc % d == 0 and d <= cap]

    def score(bc):
        steps = nc // bc
        # prefer: even step count (2 TCs on v7x), then >= 2 steps, then bigger Bc
        return (steps >= 2 and steps % 2 == 0, steps >= 2, bc)

    return max(divisors, key=score)


def _make_ssim_kernel(Hp: int, Wp: int, H: int, W: int, Bc: int):
    C1 = 0.01 ** 2
    C2 = 0.03 ** 2
    HIGHEST = jax.lax.Precision.HIGHEST
    needs_mask = (Hp != H) or (Wp != W)

    def kernel(ah_ref, bw_ref, x1_ref, x2_ref, out_ref, s_ref, t_ref):
        ah = ah_ref[...]                     # (Hp, Hp) vertical band
        bw = bw_ref[...]                     # (Wp, Wp) horizontal band

        if needs_mask:
            rows = jax.lax.broadcasted_iota(jnp.int32, (Hp, Wp), 0)
            cols = jax.lax.broadcasted_iota(jnp.int32, (Hp, Wp), 1)
            mask = ((rows < H) & (cols < W)).astype(jnp.float32)

        def body(b, acc):
            xa = x1_ref[b]                   # (Hp, Wp)
            xb = x2_ref[b]                   # (Hp, Wp)

            # Build 5-channel sublane-stacked slab in persistent VMEM scratch.
            s_ref[0:Hp, :] = xa
            s_ref[Hp:2 * Hp, :] = xb
            s_ref[2 * Hp:3 * Hp, :] = xa * xa
            s_ref[3 * Hp:4 * Hp, :] = xb * xb
            s_ref[4 * Hp:5 * Hp, :] = xa * xb

            # Fused horizontal (lane-axis) pass: ONE MXU matmul for 5 channels.
            th = jnp.dot(s_ref[...], bw,
                         preferred_element_type=jnp.float32,
                         precision=HIGHEST)          # (5Hp, Wp)

            # Restack to lane-stacked (Hp, 5Wp) so the vertical pass is also ONE
            # matmul (aligned slab copies: Hp multiple of 8, Wp multiple of 128).
            t_ref[:, 0:Wp] = th[0:Hp, :]
            t_ref[:, Wp:2 * Wp] = th[Hp:2 * Hp, :]
            t_ref[:, 2 * Wp:3 * Wp] = th[2 * Hp:3 * Hp, :]
            t_ref[:, 3 * Wp:4 * Wp] = th[3 * Hp:4 * Hp, :]
            t_ref[:, 4 * Wp:5 * Wp] = th[4 * Hp:5 * Hp, :]

            v = jnp.dot(ah, t_ref[...],
                        preferred_element_type=jnp.float32,
                        precision=HIGHEST)           # (Hp, 5Wp)

            mu1 = v[:, 0:Wp]
            mu2 = v[:, Wp:2 * Wp]
            e11 = v[:, 2 * Wp:3 * Wp]
            e22 = v[:, 3 * Wp:4 * Wp]
            e12 = v[:, 4 * Wp:5 * Wp]

            mu1mu2 = mu1 * mu2
            musq = mu1 * mu1 + mu2 * mu2                     # mu1^2 + mu2^2
            num = (2.0 * mu1mu2 + C1) * (2.0 * (e12 - mu1mu2) + C2)
            den = (musq + C1) * ((e11 + e22 - musq) + C2)
            ssim = num * pl.reciprocal(den)                  # exact reciprocal
            if needs_mask:
                ssim = ssim * mask
            return acc + jnp.sum(ssim)

        total = jax.lax.fori_loop(0, Bc, body, jnp.float32(0.0))
        out_ref[...] = jnp.full(out_ref.shape, total, dtype=jnp.float32)

    return kernel


def ssim_loss(img1, img2, win_size: int = 11, win_sigma: float = 1.5):
    """1 - SSIM(img1, img2), size_average=True. img1/img2: (N, C, H, W)."""
    assert img1.shape == img2.shape and img1.ndim == 4
    N, C, H, W = img1.shape
    NC = N * C

    # Sublane/lane-aligned padded extents (zero padding == conv's zero padding).
    Hp = max(8, ((H + 7) // 8) * 8)
    Wp = max(128, ((W + 127) // 128) * 128)

    g = _gaussian_1d(win_size, win_sigma)
    ah = jnp.asarray(_band_matrix(Hp, g))        # out = ah @ x   (vertical)
    bw = jnp.asarray(_band_matrix(Wp, g).T)      # out = x @ bw   (horizontal)

    x1 = img1.astype(jnp.float32).reshape(NC, H, W)
    x2 = img2.astype(jnp.float32).reshape(NC, H, W)
    if (Hp, Wp) != (H, W):
        pad = ((0, 0), (0, Hp - H), (0, Wp - W))
        x1 = jnp.pad(x1, pad)
        x2 = jnp.pad(x2, pad)

    vmem_cap = _vmem_capacity_bytes()
    Bc = _pick_block_planes(NC, Hp, Wp, int(vmem_cap * 0.6))
    steps = NC // Bc
    kernel = _make_ssim_kernel(Hp, Wp, H, W, Bc)

    # VMEM footprint: double-buffered image inputs + double-buffered band
    # matrices + persistent scratches + per-iteration matmul/SSIM temporaries.
    est = (16 * Bc * Hp * Wp
           + 8 * (Hp * Hp + Wp * Wp)
           + 40 * Hp * Wp            # (5Hp,Wp) + (Hp,5Wp) scratches
           + 160 * Hp * Wp           # th, v, mu/e temporaries (+ margin)
           + (2 << 20))
    vmem_limit = int(min(max(est, 16 << 20), int(vmem_cap * 0.9)))

    out = pl.pallas_call(
        kernel,
        out_shape=jax.ShapeDtypeStruct((steps, 8, 128), jnp.float32),
        grid=(steps,),
        in_specs=[
            pl.BlockSpec((Hp, Hp), lambda i: (0, 0)),
            pl.BlockSpec((Wp, Wp), lambda i: (0, 0)),
            pl.BlockSpec((Bc, Hp, Wp), lambda i: (i, 0, 0)),
            pl.BlockSpec((Bc, Hp, Wp), lambda i: (i, 0, 0)),
        ],
        # One lane-dense partial-sum block per grid step -> no resident scalar
        # accumulator, no serial RMW; final reduction happens in JAX.
        out_specs=pl.BlockSpec((1, 8, 128), lambda i: (i, 0, 0)),
        scratch_shapes=[
            pltpu.VMEM((5 * Hp, Wp), jnp.float32),   # sublane-stacked channels
            pltpu.VMEM((Hp, 5 * Wp), jnp.float32),   # lane-stacked conv results
        ],
        compiler_params=pltpu.CompilerParams(
            dimension_semantics=("parallel",),
            vmem_limit_bytes=vmem_limit,
        ),
    )(ah, bw, x1, x2)

    total = jnp.sum(out[:, 0, 0])
    return 1.0 - total / float(NC * H * W)


def _ssim_loss_ref(img1, img2, win_size: int = 11, win_sigma: float = 1.5):
    # Pure-JAX reference (explicit depthwise 2D conv with the outer-product window).
    N, C, H, W = img1.shape
    P = win_size // 2
    g = _gaussian_1d(win_size, win_sigma)
    w2d = jnp.asarray(np.outer(g, g), jnp.float32)  # (KS, KS)

    def conv(x):  # x: (N, C, H, W)
        xp = jnp.pad(x, ((0, 0), (0, 0), (P, P), (P, P)))
        out = jnp.zeros((N, C, H, W), jnp.float32)
        for ky in range(win_size):
            for kx in range(win_size):
                out = out + w2d[ky, kx] * xp[:, :, ky:ky + H, kx:kx + W]
        return out

    mu1, mu2 = conv(img1), conv(img2)
    s11 = conv(img1 * img1) - mu1 * mu1
    s22 = conv(img2 * img2) - mu2 * mu2
    s12 = conv(img1 * img2) - mu1 * mu2
    C1, C2 = 0.01 ** 2, 0.03 ** 2
    ssim_map = ((2 * mu1 * mu2 + C1) * (2 * s12 + C2)) / (
        (mu1 * mu1 + mu2 * mu2 + C1) * (s11 + s22 + C2)
    )
    return 1.0 - jnp.mean(ssim_map)


if __name__ == "__main__":
    key = jax.random.PRNGKey(0)
    k1, k2 = jax.random.split(key)
    N, C, H, W = 2, 3, 16, 16
    img1 = jax.random.uniform(k1, (N, C, H, W), dtype=jnp.float32)
    img2 = jax.random.uniform(k2, (N, C, H, W), dtype=jnp.float32)

    loss = jax.block_until_ready(ssim_loss(img1, img2))

    ref = jax.block_until_ready(_ssim_loss_ref(img1, img2))
    np.testing.assert_allclose(np.array(loss), np.array(ref), rtol=1e-5, atol=1e-5)

    # Sanity: identical images -> SSIM == 1 -> loss == 0.
    loss_same = jax.block_until_ready(ssim_loss(img1, img1))
    np.testing.assert_allclose(np.array(loss_same), 0.0, atol=1e-5)

    print("KERNEL_OK")
</pallas_src>

<mosaic_0001>
module attributes {stable_mosaic.version = 11 : i64} {
  func.func @kernel(%arg0: i32, %arg1: memref<16x16xf32, #tpu.memory_space<vmem>>, %arg2: memref<128x128xf32, #tpu.memory_space<vmem>>, %arg3: memref<3x16x128xf32, #tpu.memory_space<vmem>>, %arg4: memref<3x16x128xf32, #tpu.memory_space<vmem>>, %arg5: memref<1x8x128xf32, #tpu.memory_space<vmem>>, %arg6: memref<80x128xf32, #tpu.memory_space<vmem>>, %arg7: memref<16x640xf32, #tpu.memory_space<vmem>>) attributes {dimension_semantics = [#tpu.dimension_semantics<parallel>], iteration_bounds = array<i64: 2>, scalar_prefetch = 0 : i64, scratch_operands = 2 : i64, tpu.core_type = #tpu.core_type<tc>, window_params = [{pipeline_mode = #tpu.pipeline_mode<synchronous>, transform_indices = @transform_0, window_bounds = array<i64: 16, 16>}, {pipeline_mode = #tpu.pipeline_mode<synchronous>, transform_indices = @transform_1, window_bounds = array<i64: 128, 128>}, {transform_indices = @transform_2, window_bounds = array<i64: 3, 16, 128>}, {transform_indices = @transform_3, window_bounds = array<i64: 3, 16, 128>}, {transform_indices = @transform_4, window_bounds = array<i64: 1, 8, 128>}]} {
    %c0 = arith.constant 0 : index
    %c0_0 = arith.constant 0 : index
    %0 = vector.load %arg1[%c0, %c0_0] : memref<16x16xf32, #tpu.memory_space<vmem>>, vector<16x16xf32>
    %c0_1 = arith.constant 0 : index
    %c0_2 = arith.constant 0 : index
    %1 = vector.load %arg2[%c0_1, %c0_2] : memref<128x128xf32, #tpu.memory_space<vmem>>, vector<128x128xf32>
    %2 = tpu.iota {dimensions = array<i32: 0>} : vector<16x128xi32>
    %3 = tpu.iota {dimensions = array<i32: 1>} : vector<16x128xi32>
    %c16_i32 = arith.constant 16 : i32
    %4 = vector.broadcast %c16_i32 : i32 to vector<16x128xi32>
    %5 = arith.cmpi slt, %2, %4 : vector<16x128xi32>
    %c16_i32_3 = arith.constant 16 : i32
    %6 = vector.broadcast %c16_i32_3 : i32 to vector<16x128xi32>
    %7 = arith.cmpi slt, %3, %6 : vector<16x128xi32>
    %8 = arith.andi %5, %7 : vector<16x128xi1>
    %9 = arith.extui %8 : vector<16x128xi1> to vector<16x128xi32>
    %10 = arith.sitofp %9 : vector<16x128xi32> to vector<16x128xf32>
    %cst = arith.constant 0.000000e+00 : f32
    %c0_i32 = arith.constant 0 : i32
    %c3_i32 = arith.constant 3 : i32
    %11 = arith.addi %c0_i32, %c3_i32 : i32
    %c1_i32 = arith.constant 1 : i32
    %12 = scf.for %arg8 = %c0_i32 to %11 step %c1_i32 iter_args(%arg9 = %cst) -> (f32)  : i32 {
      %15 = arith.index_cast %arg8 : i32 to index
      %c0_8 = arith.constant 0 : index
      %c0_9 = arith.constant 0 : index
      %16 = vector.load %arg3[%15, %c0_8, %c0_9] : memref<3x16x128xf32, #tpu.memory_space<vmem>>, vector<1x16x128xf32>
      %17 = vector.shape_cast %16 : vector<1x16x128xf32> to vector<16x128xf32>
      %18 = arith.index_cast %arg8 : i32 to index
      %c0_10 = arith.constant 0 : index
      %c0_11 = arith.constant 0 : index
      %19 = vector.load %arg4[%18, %c0_10, %c0_11] : memref<3x16x128xf32, #tpu.memory_space<vmem>>, vector<1x16x128xf32>
      %20 = vector.shape_cast %19 : vector<1x16x128xf32> to vector<16x128xf32>
      %c0_12 = arith.constant 0 : index
      %c0_13 = arith.constant 0 : index
      %21 = vector.load %arg6[%c0_12, %c0_13] : memref<80x128xf32, #tpu.memory_space<vmem>>, vector<16x128xf32>
      tpu.vector_store %arg6[%c0_12, %c0_13], %17 {strides = array<i32>} : memref<80x128xf32, #tpu.memory_space<vmem>>, vector<16x128xf32>,
      %c16 = arith.constant 16 : index
      %c0_14 = arith.constant 0 : index
      %22 = vector.load %arg6[%c16, %c0_14] : memref<80x128xf32, #tpu.memory_space<vmem>>, vector<16x128xf32>
      tpu.vector_store %arg6[%c16, %c0_14], %20 {strides = array<i32>} : memref<80x128xf32, #tpu.memory_space<vmem>>, vector<16x128xf32>,
      %23 = arith.mulf %17, %17 : vector<16x128xf32>
      %c32 = arith.constant 32 : index
      %c0_15 = arith.constant 0 : index
      %24 = vector.load %arg6[%c32, %c0_15] : memref<80x128xf32, #tpu.memory_space<vmem>>, vector<16x128xf32>
      tpu.vector_store %arg6[%c32, %c0_15], %23 {strides = array<i32>} : memref<80x128xf32, #tpu.memory_space<vmem>>, vector<16x128xf32>,
      %25 = arith.mulf %20, %20 : vector<16x128xf32>
      %c48 = arith.constant 48 : index
      %c0_16 = arith.constant 0 : index
      %26 = vector.load %arg6[%c48, %c0_16] : memref<80x128xf32, #tpu.memory_space<vmem>>, vector<16x128xf32>
      tpu.vector_store %arg6[%c48, %c0_16], %25 {strides = array<i32>} : memref<80x128xf32, #tpu.memory_space<vmem>>, vector<16x128xf32>,
      %27 = arith.mulf %17, %20 : vector<16x128xf32>
      %c64 = arith.constant 64 : index
      %c0_17 = arith.constant 0 : index
      %28 = vector.load %arg6[%c64, %c0_17] : memref<80x128xf32, #tpu.memory_space<vmem>>, vector<16x128xf32>
      tpu.vector_store %arg6[%c64, %c0_17], %27 {strides = array<i32>} : memref<80x128xf32, #tpu.memory_space<vmem>>, vector<16x128xf32>,
      %c0_18 = arith.constant 0 : index
      %c0_19 = arith.constant 0 : index
      %29 = vector.load %arg6[%c0_18, %c0_19] : memref<80x128xf32, #tpu.memory_space<vmem>>, vector<80x128xf32>
      %cst_20 = arith.constant dense<0.000000e+00> : vector<80x128xf32>
      %30 = tpu.matmul %29, %1, %cst_20 {dimension_numbers = #tpu.dot_dimension_numbers<[1], [0], [0], [1], [0, 0, 1, 1], [], []>, precision = #tpu.contract_precision<fp32>} : vector<80x128xf32>, vector<128x128xf32>, vector<80x128xf32> -> vector<80x128xf32>
      %31 = vector.extract_strided_slice %30 {offsets = [0, 0], sizes = [16, 128], strides = [1, 1]} : vector<80x128xf32> to vector<16x128xf32>
      %c0_21 = arith.constant 0 : index
      %c0_22 = arith.constant 0 : index
      %32 = vector.load %arg7[%c0_21, %c0_22] : memref<16x640xf32, #tpu.memory_space<vmem>>, vector<16x128xf32>
      tpu.vector_store %arg7[%c0_21, %c0_22], %31 {strides = array<i32>} : memref<16x640xf32, #tpu.memory_space<vmem>>, vector<16x128xf32>,
      %33 = vector.extract_strided_slice %30 {offsets = [16, 0], sizes = [16, 128], strides = [1, 1]} : vector<80x128xf32> to vector<16x128xf32>
      %c0_23 = arith.constant 0 : index
      %c128 = arith.constant 128 : index
      %34 = vector.load %arg7[%c0_23, %c128] : memref<16x640xf32, #tpu.memory_space<vmem>>, vector<16x128xf32>
      tpu.vector_store %arg7[%c0_23, %c128], %33 {strides = array<i32>} : memref<16x640xf32, #tpu.memory_space<vmem>>, vector<16x128xf32>,
      %35 = vector.extract_strided_slice %30 {offsets = [32, 0], sizes = [16, 128], strides = [1, 1]} : vector<80x128xf32> to vector<16x128xf32>
      %c0_24 = arith.constant 0 : index
      %c256 = arith.constant 256 : index
      %36 = vector.load %arg7[%c0_24, %c256] : memref<16x640xf32, #tpu.memory_space<vmem>>, vector<16x128xf32>
      tpu.vector_store %arg7[%c0_24, %c256], %35 {strides = array<i32>} : memref<16x640xf32, #tpu.memory_space<vmem>>, vector<16x128xf32>,
      %37 = vector.extract_strided_slice %30 {offsets = [48, 0], sizes = [16, 128], strides = [1, 1]} : vector<80x128xf32> to vector<16x128xf32>
      %c0_25 = arith.constant 0 : index
      %c384 = arith.constant 384 : index
      %38 = vector.load %arg7[%c0_25, %c384] : memref<16x640xf32, #tpu.memory_space<vmem>>, vector<16x128xf32>
      tpu.vector_store %arg7[%c0_25, %c384], %37 {strides = array<i32>} : memref<16x640xf32, #tpu.memory_space<vmem>>, vector<16x128xf32>,
      %39 = vector.extract_strided_slice %30 {offsets = [64, 0], sizes = [16, 128], strides = [1, 1]} : vector<80x128xf32> to vector<16x128xf32>
      %c0_26 = arith.constant 0 : index
      %c512 = arith.constant 512 : index
      %40 = vector.load %arg7[%c0_26, %c512] : memref<16x640xf32, #tpu.memory_space<vmem>>, vector<16x128xf32>
      tpu.vector_store %arg7[%c0_26, %c512], %39 {strides = array<i32>} : memref<16x640xf32, #tpu.memory_space<vmem>>, vector<16x128xf32>,
      %c0_27 = arith.constant 0 : index
      %c0_28 = arith.constant 0 : index
      %41 = vector.load %arg7[%c0_27, %c0_28] : memref<16x640xf32, #tpu.memory_space<vmem>>, vector<16x640xf32>
      %cst_29 = arith.constant dense<0.000000e+00> : vector<16x640xf32>
      %42 = tpu.matmul %0, %41, %cst_29 {dimension_numbers = #tpu.dot_dimension_numbers<[1], [0], [0], [1], [0, 0, 1, 1], [], []>, precision = #tpu.contract_precision<fp32>} : vector<16x16xf32>, vector<16x640xf32>, vector<16x640xf32> -> vector<16x640xf32>
      %43 = vector.extract_strided_slice %42 {offsets = [0, 0], sizes = [16, 128], strides = [1, 1]} : vector<16x640xf32> to vector<16x128xf32>
      %44 = vector.extract_strided_slice %42 {offsets = [0, 128], sizes = [16, 128], strides = [1, 1]} : vector<16x640xf32> to vector<16x128xf32>
      %45 = vector.extract_strided_slice %42 {offsets = [0, 256], sizes = [16, 128], strides = [1, 1]} : vector<16x640xf32> to vector<16x128xf32>
      %46 = vector.extract_strided_slice %42 {offsets = [0, 384], sizes = [16, 128], strides = [1, 1]} : vector<16x640xf32> to vector<16x128xf32>
      %47 = vector.extract_strided_slice %42 {offsets = [0, 512], sizes = [16, 128], strides = [1, 1]} : vector<16x640xf32> to vector<16x128xf32>
      %48 = arith.mulf %43, %44 : vector<16x128xf32>
      %49 = arith.mulf %43, %43 : vector<16x128xf32>
      %50 = arith.mulf %44, %44 : vector<16x128xf32>
      %51 = arith.addf %49, %50 : vector<16x128xf32>
      %cst_30 = arith.constant 2.000000e+00 : f32
      %52 = vector.broadcast %cst_30 : f32 to vector<16x128xf32>
      %53 = arith.mulf %52, %48 : vector<16x128xf32>
      %cst_31 = arith.constant 9.99999974E-5 : f32
      %54 = vector.broadcast %cst_31 : f32 to vector<16x128xf32>
      %55 = arith.addf %53, %54 : vector<16x128xf32>
      %56 = arith.subf %47, %48 : vector<16x128xf32>
      %cst_32 = arith.constant 2.000000e+00 : f32
      %57 = vector.broadcast %cst_32 : f32 to vector<16x128xf32>
      %58 = arith.mulf %57, %56 : vector<16x128xf32>
      %cst_33 = arith.constant 8.99999984E-4 : f32
      %59 = vector.broadcast %cst_33 : f32 to vector<16x128xf32>
      %60 = arith.addf %58, %59 : vector<16x128xf32>
      %61 = arith.mulf %55, %60 : vector<16x128xf32>
      %cst_34 = arith.constant 9.99999974E-5 : f32
      %62 = vector.broadcast %cst_34 : f32 to vector<16x128xf32>
      %63 = arith.addf %51, %62 : vector<16x128xf32>
      %64 = arith.addf %45, %46 : vector<16x128xf32>
      %65 = arith.subf %64, %51 : vector<16x128xf32>
      %cst_35 = arith.constant 8.99999984E-4 : f32
      %66 = vector.broadcast %cst_35 : f32 to vector<16x128xf32>
      %67 = arith.addf %65, %66 : vector<16x128xf32>
      %68 = arith.mulf %63, %67 : vector<16x128xf32>
      %69 = tpu.reciprocal %68 : vector<16x128xf32> -> vector<16x128xf32>
      %70 = arith.mulf %61, %69 : vector<16x128xf32>
      %71 = arith.mulf %70, %10 : vector<16x128xf32>
      %72 = vector.shape_cast %71 : vector<16x128xf32> to vector<1x16x128xf32>
      %cst_36 = arith.constant dense<0.000000e+00> : vector<1xf32>
      %73 = vector.multi_reduction <add>, %72, %cst_36 [1, 2] : vector<1x16x128xf32> to vector<1xf32>
      %74 = vector.shape_cast %73 : vector<1xf32> to vector<1x1x1xf32>
      %75 = vector.extract %74[0, 0, 0] : f32 from vector<1x1x1xf32>
      %76 = arith.addf %arg9, %75 : f32
      scf.yield %76 : f32
    }
    %c3_i32_4 = arith.constant 3 : i32
    %13 = vector.broadcast %12 : f32 to vector<1x8x128xf32>
    %c0_5 = arith.constant 0 : index
    %c0_6 = arith.constant 0 : index
    %c0_7 = arith.constant 0 : index
    %14 = vector.load %arg5[%c0_5, %c0_6, %c0_7] : memref<1x8x128xf32, #tpu.memory_space<vmem>>, vector<1x8x128xf32>
    tpu.vector_store %arg5[%c0_5, %c0_6, %c0_7], %13 {strides = array<i32>} : memref<1x8x128xf32, #tpu.memory_space<vmem>>, vector<1x8x128xf32>,
    return
  }
  func.func @transform_0(%arg0: i32) -> (i32, i32) {
    %c0_i32 = arith.constant 0 : i32
    %c0_i32_0 = arith.constant 0 : i32
    %c0_i32_1 = arith.constant 0 : i32
    return %c0_i32, %c0_i32_0 : i32, i32
  }
  func.func @transform_1(%arg0: i32) -> (i32, i32) {
    %c0_i32 = arith.constant 0 : i32
    %c0_i32_0 = arith.constant 0 : i32
    %c0_i32_1 = arith.constant 0 : i32
    return %c0_i32, %c0_i32_0 : i32, i32
  }
  func.func @transform_2(%arg0: i32) -> (i32, i32, i32) {
    %c0_i32 = arith.constant 0 : i32
    %c0_i32_0 = arith.constant 0 : i32
    %c0_i32_1 = arith.constant 0 : i32
    return %arg0, %c0_i32, %c0_i32_0 : i32, i32, i32
  }
  func.func @transform_3(%arg0: i32) -> (i32, i32, i32) {
    %c0_i32 = arith.constant 0 : i32
    %c0_i32_0 = arith.constant 0 : i32
    %c0_i32_1 = arith.constant 0 : i32
    return %arg0, %c0_i32, %c0_i32_0 : i32, i32, i32
  }
  func.func @transform_4(%arg0: i32) -> (i32, i32, i32) {
    %c0_i32 = arith.constant 0 : i32
    %c0_i32_0 = arith.constant 0 : i32
    %c0_i32_1 = arith.constant 0 : i32
    return %arg0, %c0_i32, %c0_i32_0 : i32, i32, i32
  }
}

</mosaic_0001>

<bundles_post_ra>
// kernel: tpu_custom_call.1
= control target key start
LH: loop header
LB: loop body
LE: loop exit
PB: predicated region body
PF: predicated region fallthrough
CT: control target
= control target key end

     0   :  { %s5361_s0 = inlined_call_operand.hbm [shape: f32[16,16], index: 0, kind: input, shape index: {}]   ;;  %s5362_s1 = inlined_call_operand.hbm [shape: f32[128,128], index: 1, kind: input, shape index: {}]   ;;  %s5363_s2 = inlined_call_operand.hbm [shape: f32[6,16,128], index: 2, kind: input, shape index: {}]   ;;  %s5364_s3 = inlined_call_operand.hbm [shape: f32[6,16,128], index: 3, kind: input, shape index: {}]   ;;  %s5365_s4 = inlined_call_operand.hbm [shape: f32[2,8,128], index: 4, kind: output, shape index: {}]  }
   0x1   :  { %5404 = sst [smem:[#allocation30_spill]] %s5361_s0 }
   0x2   :  { %9 = vsyncpa [#allocation5], 0 }
   0x3   :  { %10 = vsyncpa [#allocation8], 0 }
   0x4   :  { %11 = vsyncpa [#allocation6], 0 }
   0x5   :  { %13 = vsyncpa [#allocation6 + $0x1], 0  ;;  %s4414_s15 = smov 0   ;;  %s4416_s16 = smov 0  }
   0x6   :  { %s4418_s17 = smov 0   ;;  %s4420_s18 = smov 0  }
   0x7 LB: > { %s4435_s19 = sadd.s32 4294967295, %s4370_s18   ;;  %s3177_s20 = sadd.s32 4294967294, %s4370_s18   ;;  %s4370_s18 = sphi %s4420_s18, %s5477_s18   ;;  %s4366_s17 = sphi %s4418_s17, %s5476_s17   ;;  %s4362_s16 = sphi %s4416_s16, %s5475_s16   ;;  %s4358_s15 = sphi %s4414_s15, %s5474_s15  }
   0x8   : > { %s4439_s21 = sadd.s32 1, %s4370_s18   ;;  %s68_s22 = sadd.s32 1, %s4366_s17 }
   0x9   : > { %s65_s23 = ssub.s32 %s4370_s18, %s4439_s21  ;;  %p75_p0 = scmp.ne.s32.totalorder %s4366_s17, %s4362_s16 }
   0xa   : > { %p66_p1 = scmp.eq.s32.totalorder %s65_s23, 0  ;;  %p76_p2 = scmp.eq.s32.totalorder %s4370_s18, 0 }
   0xb   : > { %p81_p3 = scmp.ne.s32.totalorder %s4362_s16, %s4358_s15  ;;  %p5366_p4 = scmp.eq.s32.totalorder %s4435_s19, 0 }
   0xc   : > { %s4451_s24 = scalar_select %p66_p1, %s4366_s17, %s68_s22  }
   0xd   : > { %p4453_p5 = por %p76_p2, %p75_p0  ;;  %p4459_p6 = por %p5366_p4, %p81_p3 }
   0xe   : > { %p131_p7 = scmp.eq.s32.totalorder %s4435_s19, 1  ;;  %p137_p8 = scmp.eq.s32.totalorder %s3177_s20, 1 }
   0xf   : > { %s5405_s25 = scalar_select %p4453_p5, 1, 0 }
  0x10   : > { %s5406_s26 = scalar_select %p4459_p6, 1, 0 }
  0x11   : > { %p3178_p9 = scmp.ge.s32.totalorder %s4370_s18, 1  ;;  %p144_p10 = scmp.lt.s32.totalorder %s4370_s18, 3 }
  0x12   : > { %p4466_p11 = por %p131_p7, %p75_p0  ;;  %p4470_p12 = por %p137_p8, %p81_p3 }
  0x13   : > { %p4474_p13 = pnand %p3178_p9, %p144_p10  ;;  %s4380_s30 = smov [#allocation4]  }
  0x14   : > { %s5407_s27 = scalar_select %p4466_p11, 1, 0 }
  0x15   : > { %s5408_s28 = scalar_select %p4470_p12, 1, 0 }
  0x16   : > { %s5409_s29 = scalar_select %p4474_p13, 1, 0 }
  0x17   : > { %p4090_p1 = pneg %p4474_p13  ;;  %s156_s5 = sshll.u32 %s4380_s30, 4  ;;  %s157_s5 = int_to_ptr.vmem [resolvable:$true] %s156_s5 }
  0x18   : > { %s5411_s0 = sld [smem:[#allocation30_spill]] }
  0x19   : > { %p4482_p2 = pnand %p4090_p1, %p5366_p4 }
  0x1b   : > { %p5373_p8 = pneg %p4482_p2 }
  0x1e   : > { %s4172_s10 = scalar_lea.hbm %s5411_s0, 256 }
  0x1f   : > { %p4173_p7 = scmp.ne.s32.totalorder %s5411_s0, %s4172_s10  ;;  %p4179_p1 = scmp.lt.u32.totalorder %s4172_s10, %s5411_s0 }
  0x21   : > { %p4175_p9 = pnand %p5373_p8, %p4173_p7 }
  0x23   : > { %p4176_p10 = pneg %p4175_p9 }
  0x25   : > { %p4181_p0 = pnand %p4179_p1, %p4176_p10 }
  0x27   : > { %4184 = shalt.err (!%p4181_p0)
}
  0x28   : > { %s4185_s20 = scalar_lea.vmem %s157_s5, 256  ;;  %p4193_p11 = scmp.lt.s32.totalorder %s157_s5, %s157_s5 }
  0x29   : > { %p4186_p4 = scmp.ne.s32.totalorder %s157_s5, %s4185_s20  ;;  %p4194_p6 = scmp.lt.s32.totalorder %s4185_s20, %s4185_s20 }
  0x2b   : > { %p4188_p3 = pnand %p4186_p4, %p5373_p8  ;;  %p4195_p13 = por %p4194_p6, %p4193_p11 }
  0x2d   : > { %p4189_p12 = pneg %p4188_p3 }
  0x2f   : > { %p4196_p5 = pnand %p4195_p13, %p4189_p12 }
  0x31   : > { %4199 = shalt.err (!%p4196_p5)
}
  0x32   : > { %s5371_s22 = smov 128   ;;  %s4382_s23 = smov 8  }
  0x33   : > { %4093 = dma.hbm_to_vmem [thread:$0]  (!%p4482_p2), %s5411_s0, 256, %s157_s5, [#allocation5], %s5371_s22, %s5371_s22, %s4382_s23  }
  0x34   : > { %p5412_p4 = scmp.ne.s32.totalorder %s5405_s25, 0  ;;  %p5413_p6 = scmp.lt.s32.totalorder %s4370_s18, 2 }
  0x35   : > { %s185_s10 = sand.u32 1, %s4366_s17   ;;  %s5370_s12 = smul.u32 768, %s4370_s18 }
  0x36   : > { %p4518_p5 = pnand %p5413_p6, %p5412_p4  ;;  %s4523_s11 = smul.u32 48, %s185_s10 }
  0x37   : > { %s4383_s13 = smov [#allocation7]   ;;  %s4531_s5 = scalar_lea.hbm %s5363_s2, %s5370_s12 }
  0x38   : > { %s169_s14 = sshll.u32 %s4383_s13, 4  ;;  %s187_s25 = scalar_lea.vmem [#allocation9], %s4523_s11  ;;  %s4536_s14 = int_to_ptr.vmem [resolvable:$true] %s169_s14 }
  0x39   : > { %s195_s30 = sshll.u32 %s187_s25, 4  ;;  %s5415_s8 = sand.u32 1, %s4370_s18   ;;  %s4534_s30 = int_to_ptr.vmem [resolvable:$true] %s195_s30 }
  0x3a   : > { %s4540_s10 = scalar_lea.sflag [#allocation5], %s5415_s8  ;;  %s4200_s13 = scalar_lea.hbm %s4531_s5, 768 }
  0x3b   : > { %p4201_p11 = scmp.ne.s32.totalorder %s4531_s5, %s4200_s13  ;;  %p4202_p12 = pneg %p4518_p5 }
  0x3c   : > { %s4205_s12 = scalar_lea.hbm %s5363_s2, 1536  ;;  %p4206_p3 = scmp.lt.u32.totalorder %s4531_s5, %s5363_s2 }
  0x3d   : > { %p4203_p13 = pnand %p4202_p12, %p4201_p11  ;;  %p4207_p7 = scmp.lt.u32.totalorder %s4205_s12, %s4200_s13 }
  0x3e   : > { %p4209_p10 = scmp.lt.u32.totalorder %s4200_s13, %s4531_s5 }
  0x3f   : > { %p4204_p0 = pneg %p4203_p13  ;;  %p4208_p9 = por %p4207_p7, %p4206_p3 }
  0x41   : > { %p4210_p1 = por %p4209_p10, %p4208_p9 }
  0x43   : > { %p4211_p4 = pnand %p4210_p1, %p4204_p0 }
  0x45   : > { %4214 = shalt.err (!%p4211_p4)
}
  0x46   : > { %s4215_s8 = scalar_lea.vmem %s4534_s30, 768  ;;  %s4384_s7 = smov [#allocation9]  }
  0x47   : > { %p4216_p6 = scmp.ne.s32.totalorder %s4534_s30, %s4215_s8  ;;  %s4220_s20 = sshll.u32 %s4384_s7, 4  ;;  %s4221_s20 = int_to_ptr.vmem [resolvable:$false] %s4220_s20 }
  0x48   : > { %s4222_s22 = scalar_lea.vmem %s4221_s20, 1536  ;;  %p4223_p8 = scmp.lt.s32.totalorder %s4534_s30, %s4221_s20 }
  0x49   : > { %p4218_p11 = pnand %p4216_p6, %p4202_p12  ;;  %p4224_p3 = scmp.lt.s32.totalorder %s4222_s22, %s4215_s8 }
  0x4b   : > { %p4219_p13 = pneg %p4218_p11  ;;  %p4225_p7 = por %p4224_p3, %p4223_p8 }
  0x4d   : > { %p4226_p9 = pnand %p4225_p7, %p4219_p13 }
  0x4f   : > { %4229 = shalt.err (!%p4226_p9)
}
  0x50   : > { %s5416_s12 = smov 128   ;;  %s4230_s7 = scalar_lea.hbm %s5362_s1, 2048 }
  0x51   : > { %4100 = dma.hbm_to_vmem [thread:$0]  (!%p4518_p5), %s4531_s5, 768, %s4534_s30, %s4540_s10, %s5416_s12, %s5416_s12, %s4382_s23  }
  0x52   : > { %p4231_p8 = scmp.ne.s32.totalorder %s5362_s1, %s4230_s7  ;;  %p5417_p0 = pneg %p4482_p2 }
  0x53   : > { %p4237_p4 = scmp.lt.u32.totalorder %s4230_s7, %s5362_s1 }
  0x54   : > { %p4233_p10 = pnand %p4231_p8, %p5417_p0 }
  0x56   : > { %p4234_p1 = pneg %p4233_p10 }
  0x58   : > { %p4239_p6 = pnand %p4237_p4, %p4234_p1 }
  0x5a   : > { %4242 = shalt.err (!%p4239_p6)
}
  0x5b   : > { %s4243_s5 = scalar_lea.vmem %s4536_s14, 2048  ;;  %p5418_p13 = pmov %p5417_p0 }
  0x5c   : > { %p4244_p11 = scmp.ne.s32.totalorder %s4536_s14, %s4243_s5  ;;  %p4251_p9 = scmp.lt.s32.totalorder %s4536_s14, %s4536_s14 }
  0x5d   : > { %p4252_p8 = scmp.lt.s32.totalorder %s4243_s5, %s4243_s5 }
  0x5e   : > { %p4246_p3 = pnand %p4244_p11, %p5418_p13 }
  0x5f   : > { %p4253_p0 = por %p4252_p8, %p4251_p9 }
  0x60   : > { %p4247_p7 = pneg %p4246_p3 }
  0x62   : > { %p4254_p10 = pnand %p4253_p0, %p4247_p7 }
  0x64   : > { %4257 = shalt.err (!%p4254_p10)
}
  0x65   : > { %4096 = dma.hbm_to_vmem [thread:$0]  (!%p4482_p2), %s5362_s1, 2048, %s4536_s14, [#allocation8], %s5416_s12, %s5416_s12, %s4382_s23  }
  0x66   : > { %s5419_s13 = smul.u32 768, %s4370_s18  ;;  %s209_s6 = scalar_lea.vmem [#allocation10], %s4523_s11 }
  0x67   : > { %s217_s8 = sshll.u32 %s209_s6, 4  ;;  %s4263_s0 = scalar_lea.hbm %s5364_s3, 1536  ;;  %s4607_s8 = int_to_ptr.vmem [resolvable:$true] %s217_s8 }
  0x68   : > { %s4604_s20 = scalar_lea.hbm %s5364_s3, %s5419_s13 }
  0x69   : > { %s4258_s22 = scalar_lea.hbm %s4604_s20, 768  ;;  %p4264_p6 = scmp.lt.u32.totalorder %s4604_s20, %s5364_s3 }
  0x6a   : > { %p4259_p1 = scmp.ne.s32.totalorder %s4604_s20, %s4258_s22  ;;  %p4265_p11 = scmp.lt.u32.totalorder %s4263_s0, %s4258_s22 }
  0x6b   : > { %p4267_p3 = scmp.lt.u32.totalorder %s4258_s22, %s4604_s20 }
  0x6c   : > { %p4261_p4 = pnand %p4259_p1, %p4202_p12  ;;  %p4266_p13 = por %p4265_p11, %p4264_p6 }
  0x6e   : > { %p4262_p2 = pneg %p4261_p4  ;;  %p4268_p7 = por %p4267_p3, %p4266_p13 }
  0x70   : > { %p4269_p9 = pnand %p4268_p7, %p4262_p2 }
  0x72   : > { %4272 = shalt.err (!%p4269_p9)
}
  0x73   : > { %s4273_s11 = scalar_lea.vmem %s4607_s8, 768  ;;  %s4385_s25 = smov [#allocation10]  }
  0x74   : > { %p4274_p8 = scmp.ne.s32.totalorder %s4607_s8, %s4273_s11  ;;  %s4278_s7 = sshll.u32 %s4385_s25, 4  ;;  %s4279_s7 = int_to_ptr.vmem [resolvable:$false] %s4278_s7 }
  0x75   : > { %s4280_s6 = scalar_lea.vmem %s4279_s7, 1536  ;;  %p4281_p1 = scmp.lt.s32.totalorder %s4607_s8, %s4279_s7 }
  0x76   : > { %p4276_p0 = pnand %p4274_p8, %p4202_p12  ;;  %p4282_p4 = scmp.lt.s32.totalorder %s4280_s6, %s4273_s11 }
  0x78   : > { %p4277_p10 = pneg %p4276_p0  ;;  %p4283_p6 = por %p4282_p4, %p4281_p1 }
  0x7a   : > { %p4284_p11 = pnand %p4283_p6, %p4277_p10 }
  0x7c   : > { %4287 = shalt.err (!%p4284_p11)
}
  0x7d   : > { %4103 = dma.hbm_to_vmem [thread:$0]  (!%p4518_p5), %s4604_s20, 768, %s4607_s8, %s4540_s10, %s5416_s12, %s5416_s12, %s4382_s23  }
  0x7e   : > { %p5420_p12 = scmp.ne.s32.totalorder %s5409_s29, 0 }
  0x80   : > { %229 = sbr.rel (%p5420_p12) target bundleno = 1146 (0x47a), region = 36 }
  0x87   : > { %p5421_p2 = scmp.eq.s32.totalorder %s4435_s19, 0 }
  0x89   : > { %4341 = dma.done.wait (%p5421_p2), [#allocation5], 256   ;;  %p5422_p13 = pmov %p5421_p2 }
  0x8a   : > { %p5423_p3 = pmov %p5421_p2 }
  0x8b   : > { %4343 = vsyncadd (%p5422_p13), [#allocation5], 4294967040 }
  0x8c   : > { %4345 = dma.done.wait (%p5423_p3), [#allocation8], 2048   ;;  %p5424_p7 = pmov %p5421_p2 }
  0x8d   : > { %s239_s9 = sand.u32 1, %s4435_s19   ;;  %s4648_s23 = sand.u32 1, %s4362_s16  }
  0x8e   : > { %4347 = vsyncadd (%p5424_p7), [#allocation8], 4294965248  ;;  %s4073_s29 = smul.u32 48, %s4648_s23  ;;  %s240_s10 = scalar_lea.sflag [#allocation5], %s239_s9 }
  0x8f   : > { %p5425_p5 = scmp.ne.s32.totalorder %s5406_s26, 0 }
  0x90   : > { %s4651_s12 = scalar_lea.vmem [#allocation9], %s4073_s29 }
  0x91   : > { %4349 = dma.done.wait (%p5425_p5), %s240_s10, 1536  }
  0x92   : > { %4351 = vsyncadd (%p5425_p5), %s240_s10, 4294965760  ;;  %s3189_s20 = sshll.u32 %s4648_s23, 3  ;;  %v305_v0 = vlaneseq  ;;  %v4386_v2 = vmov 0.0   ;;  %v4660_v4 = vld [vmem:[#allocation4] sm:$0xff]  ;;  %v4662_v5 = vld [vmem:[#allocation4 + $0x8] sm:$0xff]  ;;  %s4696_s26 = scalar_lea.vmem [#allocation10], %s4073_s29 }
  0x93   : > { %v4664_v6 = vld [vmem:[#allocation7] sm:$0xff]  ;;  %v4666_v7 = vld [vmem:[#allocation7 + $0x8] sm:$0xff]  ;;  %v4668_v8 = vld [vmem:[#allocation7 + $0x10] sm:$0xff]  ;;  %s4698_s8 = scalar_lea.vmem [#allocation11], %s3189_s20  ;;  %s4700_s22 = smov 0.0  }
  0x94   : > { %v306_v1 = vand.u32 127, %v305_v0  ;;  %5426 = vst [vmem:[#allocation16_spill] sm:$0xff] %v4664_v6  ;;  %5427 = vst [vmem:[#allocation17_spill] sm:$0xff] %v4666_v7  ;;  %v4670_v9 = vld [vmem:[#allocation7 + $0x18] sm:$0xff]  ;;  %v4672_v10 = vld [vmem:[#allocation7 + $0x20] sm:$0xff]  ;;  %s4702_s14 = smov 0  }
  0x95   : > { %5428 = vst [vmem:[#allocation18_spill] sm:$0xff] %v4668_v8  ;;  %5429 = vst [vmem:[#allocation19_spill] sm:$0xff] %v4670_v9  ;;  %v4674_v11 = vld [vmem:[#allocation7 + $0x28] sm:$0xff]  ;;  %v4676_v12 = vld [vmem:[#allocation7 + $0x30] sm:$0xff] }
  0x96   : > { %vm309_vm0 = vcmp.lt.s32.totalorder %v306_v1, 16  ;;  %5430 = vst [vmem:[#allocation20_spill] sm:$0xff] %v4672_v10  ;;  %5431 = vst [vmem:[#allocation21_spill] sm:$0xff] %v4674_v11  ;;  %v4678_v13 = vld [vmem:[#allocation7 + $0x38] sm:$0xff]  ;;  %v4680_v14 = vld [vmem:[#allocation7 + $0x40] sm:$0xff] }
  0x97   : > { %v4658_v3 = vsel %vm309_vm0, 1.0, %v4386_v2  ;;  %5432 = vst [vmem:[#allocation22_spill] sm:$0xff] %v4676_v12  ;;  %5433 = vst [vmem:[#allocation23_spill] sm:$0xff] %v4678_v13  ;;  %v4682_v15 = vld [vmem:[#allocation7 + $0x48] sm:$0xff]  ;;  %v4684_v16 = vld [vmem:[#allocation7 + $0x50] sm:$0xff] }
  0x98   : > { %5434 = vst [vmem:[#allocation24_spill] sm:$0xff] %v4680_v14  ;;  %5435 = vst [vmem:[#allocation25_spill] sm:$0xff] %v4682_v15  ;;  %v4686_v17 = vld [vmem:[#allocation7 + $0x58] sm:$0xff]  ;;  %v4688_v18 = vld [vmem:[#allocation7 + $0x60] sm:$0xff] }
  0x99   : > { %5436 = vst [vmem:[#allocation26_spill] sm:$0xff] %v4684_v16  ;;  %5437 = vst [vmem:[#allocation27_spill] sm:$0xff] %v4686_v17  ;;  %v4690_v19 = vld [vmem:[#allocation7 + $0x68] sm:$0xff]  ;;  %v4692_v20 = vld [vmem:[#allocation7 + $0x70] sm:$0xff] }
  0x9a   : > { %5438 = vst [vmem:[#allocation28_spill] sm:$0xff] %v4688_v18  ;;  %5439 = vst [vmem:[#allocation29_spill] sm:$0xff] %v4690_v19  ;;  %v4694_v21 = vld [vmem:[#allocation7 + $0x78] sm:$0xff] }
  0x9b LB: >> { %v5452_v7 = vld [vmem:[#allocation17_spill] sm:$0xff]  ;;  %v5453_v6 = vld [vmem:[#allocation16_spill] sm:$0xff]  ;;  %s3192_s5 = sshll.u32 %s4378_s14, 4  ;;  %vm1404_vm1 = vcmask 130048   ;;  %s321_s14 = sadd.s32 1, %s4378_s14   ;;  %s4378_s14 = sphi %s4702_s14, %s321_s14   ;;  %s4374_s22 = sphi %s4700_s22, %s5470_s22  }
  0x9c   : >> { %v5450_v9 = vld [vmem:[#allocation19_spill] sm:$0xff]  ;;  %v5451_v8 = vld [vmem:[#allocation18_spill] sm:$0xff]  ;;  %v357_v22 = vand.u32 4294901760, %v5453_v6  ;;  %v360_v23 = vand.u32 4294901760, %v5452_v7  ;;  %s4812_s0 = scalar_lea.vmem %s4651_s12, %s3192_s5 [#allocation9]  ;;  %s327_s30 = scalar_lea.vmem %s4696_s26, %s3192_s5 [#allocation10] }
  0x9d   : >> { %v5448_v11 = vld [vmem:[#allocation21_spill] sm:$0xff]  ;;  %v5449_v10 = vld [vmem:[#allocation20_spill] sm:$0xff]  ;;  %v363_v24 = vand.u32 4294901760, %v5451_v8  ;;  %v366_v25 = vand.u32 4294901760, %v5450_v9  ;;  %p318_p9 = scmp.ge.s32.totalorder %s321_s14, 3  }
  0x9e   : >> { %v5446_v13 = vld [vmem:[#allocation23_spill] sm:$0xff]  ;;  %v5447_v12 = vld [vmem:[#allocation22_spill] sm:$0xff]  ;;  %v369_v26 = vand.u32 4294901760, %v5449_v10  ;;  %v372_v27 = vand.u32 4294901760, %v5448_v11  ;;  %v4717_v29 = vpack.c.bf16 %v360_v23, %v357_v22  ;;  %v4720_v30 = vsub.f32 %v5453_v6, %v357_v22  ;;  %s3194_s25 = sshll.u32 (%p318_p9), %s4435_s19, 7  ;;  %s3056_s29 = sshll.u32 (%p318_p9), %s4698_s8, 4  ;;  %s3057_s29 = int_to_ptr.vmem [resolvable:$true] %s3056_s29 }
  0x9f   : >> { %v5444_v15 = vld [vmem:[#allocation25_spill] sm:$0xff]  ;;  %v5445_v14 = vld [vmem:[#allocation24_spill] sm:$0xff]  ;;  %v375_v28 = vand.u32 4294901760, %v5447_v12  ;;  %v4723_v31 = vsub.f32 %v5452_v7, %v360_v23  ;;  %v378_v32 = vand.u32 4294901760, %v5446_v13  ;;  %v4726_v33 = vpack.c.bf16 %v366_v25, %v363_v24  ;;  %s5322_s9 = scalar_lea.hbm (%p318_p9), %s5365_s4, %s3194_s25  ;;  %s3043_s10 = scalar_lea.sflag (%p318_p9), [#allocation6], %s4648_s23 }
  0xa0   : >> { %v5442_v17 = vld [vmem:[#allocation27_spill] sm:$0xff]  ;;  %v5443_v16 = vld [vmem:[#allocation26_spill] sm:$0xff]  ;;  %v4729_v34 = vsub.f32 %v5451_v8, %v363_v24  ;;  %v4732_v35 = vsub.f32 %v5450_v9, %v366_v25  ;;  %v4735_v36 = vsub.f32 %v5449_v10, %v369_v26  ;;  %v5385_v37 = vand.u32 4294901760, %v4720_v30  ;;  %3708 = vmatprep.subr.bf16.mxu1 %v4717_v29  ;;  %v329_v8 = vld [vmem:[%s327_s30 + $0x8] sm:$0xff]  ;;  %s4288_s20 = scalar_lea.vmem (%p318_p9), %s3057_s29, 128  ;;  %p5471_p0 = scmp.ne.s32.totalorder (%p318_p9), %s5407_s27, 0 }
  0xa1   : >> { %v5440_v19 = vld [vmem:[#allocation29_spill] sm:$0xff]  ;;  %v5441_v18 = vld [vmem:[#allocation28_spill] sm:$0xff]  ;;  %v5384_v38 = vand.u32 4294901760, %v4723_v31  ;;  %v4739_v39 = vpack.c.bf16 %v372_v27, %v369_v26  ;;  %v4742_v40 = vsub.f32 %v5448_v11, %v372_v27  ;;  %v4749_v44 = vsub.f32 %v5447_v12, %v375_v28  ;;  %3710 = vmatpush3.bf16.msra.mxu1 %v4717_v29  ;;  %p4289_p8 = scmp.ne.s32.totalorder (%p318_p9), %s3057_s29, %s4288_s20  ;;  %s4388_s12 = smov (%p318_p9), [#allocation11]  }
  0xa2   : >> { %v5383_v41 = vand.u32 4294901760, %v4729_v34  ;;  %v5382_v42 = vand.u32 4294901760, %v4732_v35  ;;  %v5380_v43 = vand.u32 4294901760, %v4735_v36  ;;  %v541_v45 = vsub.f32 %v4720_v30, %v5385_v37  ;;  %3712 = vmatprep.subr.bf16.mxu1 %v4726_v33  ;;  %s4292_s26 = sshll.u32 (%p318_p9), %s4388_s12, 4  ;;  %s4293_s26 = int_to_ptr.vmem [resolvable:$false] %s4292_s26 }
  0xa3   : >> { %v548_v46 = vsub.f32 %v4723_v31, %v5384_v38  ;;  %v5379_v47 = vand.u32 4294901760, %v4742_v40  ;;  %v4760_v48 = vsub.f32 %v5446_v13, %v378_v32  ;;  %v5376_v52 = vand.u32 4294901760, %v4749_v44  ;;  %p4290_p10 = pnand (%p318_p9), %p4289_p8, %p5471_p0  ;;  %p4295_p4 = scmp.lt.s32.totalorder (%p318_p9), %s3057_s29, %s4293_s26 }
  0xa4   : >> { %v555_v49 = vsub.f32 %v4729_v34, %v5383_v41  ;;  %v562_v50 = vsub.f32 %v4732_v35, %v5382_v42  ;;  %v569_v51 = vsub.f32 %v4735_v36, %v5380_v43  ;;  %v542_v53 = vand.u32 4294901760, %v541_v45 }
  0xa5   : >> { %v549_v54 = vand.u32 4294901760, %v548_v46  ;;  %v576_v55 = vsub.f32 %v4742_v40, %v5379_v47  ;;  %v5375_v56 = vand.u32 4294901760, %v4760_v48  ;;  %v583_v60 = vsub.f32 %v4749_v44, %v5376_v52  ;;  %3714 = vmatpush3.bf16.msra.mxu1 %v4726_v33  ;;  %p4291_p1 = pneg (%p318_p9), %p4290_p10 }
  0xa6   : >> { %v556_v57 = vand.u32 4294901760, %v555_v49  ;;  %v563_v58 = vand.u32 4294901760, %v562_v50  ;;  %v570_v59 = vand.u32 4294901760, %v569_v51  ;;  %v381_v0 = vand.u32 4294901760, %v5445_v14  ;;  %3716 = vmatprep.subr.bf16.mxu1 %v4739_v39 }
  0xa7   : >> { %v3739_v61 = vpack.c.bf16 %v549_v54, %v542_v53  ;;  %v577_v62 = vand.u32 4294901760, %v576_v55  ;;  %v590_v63 = vsub.f32 %v4760_v48, %v5375_v56  ;;  %v384_v2 = vand.u32 4294901760, %v5444_v15 }
  0xa8   : >> { %v3743_v1 = vpack.c.bf16 %v563_v58, %v556_v57  ;;  %v387_v22 = vand.u32 4294901760, %v5443_v16  ;;  %v4789_v23 = vpack.c.bf16 %v378_v32, %v375_v28  ;;  %v584_v24 = vand.u32 4294901760, %v583_v60 }
  0xa9   : >> { %3740 = vmatprep.subr.bf16.mxu0 %v3739_v61  ;;  %v4792_v25 = vsub.f32 %v5445_v14, %v381_v0  ;;  %v390_v26 = vand.u32 4294901760, %v5442_v17  ;;  %v3747_v27 = vpack.c.bf16 %v577_v62, %v570_v59  ;;  %v4796_v45 = vsub.f32 %v5444_v15, %v384_v2  ;;  %3718 = vmatpush3.bf16.msra.mxu1 %v4739_v39 }
  0xaa   : >> { %3742 = vmatpush3.bf16.msra.mxu0 %v3739_v61  ;;  %v4799_v46 = vsub.f32 %v5443_v16, %v387_v22  ;;  %v393_v49 = vand.u32 4294901760, %v5441_v18  ;;  %v591_v28 = vand.u32 4294901760, %v590_v63  ;;  %v4803_v32 = vpack.c.bf16 %v384_v2, %v381_v0  ;;  %3720 = vmatprep.subr.bf16.mxu1 %v4789_v23  ;;  %v4835_v2 = vld [vmem:[%s4812_s0] sm:$0xff] }
  0xab   : >> { %3744 = vmatprep.subr.bf16.mxu0 %v3743_v1  ;;  %v5374_v50 = vand.u32 4294901760, %v4792_v25  ;;  %v4807_v51 = vsub.f32 %v5442_v17, %v390_v26  ;;  %v5377_v53 = vand.u32 4294901760, %v4796_v45  ;;  %v396_v55 = vand.u32 4294901760, %v5440_v19 }
  0xac   : >> { %v5378_v54 = vand.u32 4294901760, %v4799_v46  ;;  %v4819_v57 = vsub.f32 %v5441_v18, %v393_v49  ;;  %v399_v60 = vand.u32 4294901760, %v4692_v20  ;;  %v402_v61 = vand.u32 4294901760, %v4694_v21 }
  0xad   : >> { %v597_v58 = vsub.f32 %v4792_v25, %v5374_v50  ;;  %v5381_v59 = vand.u32 4294901760, %v4807_v51  ;;  %v604_v62 = vsub.f32 %v4796_v45, %v5377_v53  ;;  %3722 = vmatpush3.bf16.msra.mxu1 %v4789_v23  ;;  %v3751_v50 = vpack.c.bf16 %v591_v28, %v584_v24 }
  0xae   : >> { %3746 = vmatpush3.bf16.msra.mxu0 %v3743_v1  ;;  %v611_v63 = vsub.f32 %v4799_v46, %v5378_v54  ;;  %v624_v0 = vand.u32 4294901760, %v4819_v57  ;;  %v4842_v52 = vsub.f32 %v5440_v19, %v396_v55  ;;  %3724 = vmatprep.subr.bf16.mxu1 %v4803_v32  ;;  %v4846_v54 = vsub.f32 %v4692_v20, %v399_v60 }
  0xaf   : >> { %3748 = vmatprep.subr.bf16.mxu0 %v3747_v27  ;;  %v598_v56 = vand.u32 4294901760, %v597_v58  ;;  %v618_v1 = vsub.f32 %v4807_v51, %v5381_v59  ;;  %v605_v53 = vand.u32 4294901760, %v604_v62  ;;  %v4850_v43 = vsub.f32 %v4694_v21, %v402_v61 }
  0xb0   : >> { %v631_v47 = vand.u32 4294901760, %v4842_v52  ;;  %v4853_v24 = vand.u32 4294901760, %v4835_v2  ;;  %v4855_v28 = vpack.c.bf16 %v390_v26, %v387_v22  ;;  %v612_v58 = vand.u32 4294901760, %v611_v63 }
  0xb1   : >> { %v619_v59 = vand.u32 4294901760, %v618_v1  ;;  %v625_v42 = vsub.f32 %v4819_v57, %v624_v0  ;;  %3726 = vmatpush3.bf16.msra.mxu1 %v4803_v32  ;;  %v3755_v62 = vpack.c.bf16 %v605_v53, %v598_v56  ;;  %v638_v38 = vand.u32 4294901760, %v4846_v54 }
  0xb2   : >> { %3750 = vmatpush3.bf16.msra.mxu0 %v3747_v27  ;;  %v632_v41 = vsub.f32 %v4842_v52, %v631_v47  ;;  %v645_v37 = vand.u32 4294901760, %v4850_v43  ;;  %3462 = vmatprep.mubr.f32.mxu0 %v4853_v24  ;;  %v4864_v22 = vpack.c.bf16 %v396_v55, %v393_v49  ;;  %v4870_v1 = vpack.c.bf16 %v402_v61, %v399_v60  ;;  %v326_v55 = vld [vmem:[%s4812_s0 + $0x8] sm:$0xff]  ;;  %v328_v61 = vld [vmem:[%s327_s30] sm:$0xff] }
  0xb3   : >> { %3752 = vmatprep.subr.bf16.mxu0 %v3751_v50  ;;  %3728 = vmatprep.subr.bf16.mxu1 %v4855_v28  ;;  %v626_v26 = vand.u32 4294901760, %v625_v42  ;;  %v3759_v56 = vpack.c.bf16 %v619_v59, %v612_v58  ;;  %v639_v53 = vsub.f32 %v4846_v54, %v638_v38  ;;  %v5455_v59 = vand.u32 4294901760, %v4723_v31 }
  0xb4   : >> { %v633_v27 = vand.u32 4294901760, %v632_v41  ;;  %v646_v63 = vsub.f32 %v4850_v43, %v645_v37  ;;  %v5454_v41 = vand.u32 4294901760, %v4720_v30  ;;  %v4884_v60 = vand.u32 4294901760, %v326_v55 }
  0xb5   : >> { %3730 = vmatpush3.bf16.msra.mxu1 %v4855_v28  ;;  %v640_v49 = vand.u32 4294901760, %v639_v53  ;;  %v5458_v53 = vand.u32 4294901760, %v4735_v36  ;;  %v5460_v7 = vand.u32 4294901760, %v4749_v44  ;;  %v4906_v9 = vsub.f32 %v4835_v2, %v4853_v24 }
  0xb6   : >> { %3754 = vmatpush3.bf16.msra.mxu0 %v3751_v50  ;;  %3732 = vmatprep.subr.bf16.mxu1 %v4864_v22  ;;  %v3763_v42 = vpack.c.bf16 %v633_v27, %v626_v26  ;;  %v647_v50 = vand.u32 4294901760, %v646_v63  ;;  %v4882_v58 = vpack.c.bf16 %v5455_v59, %v5454_v41  ;;  %v5457_v26 = vand.u32 4294901760, %v4732_v35 }
  0xb7   : >> { %3756 = vmatprep.subr.bf16.mxu0 %v3755_v62  ;;  %v5459_v63 = vand.u32 4294901760, %v4742_v40  ;;  %v5461_v41 = vand.u32 4294901760, %v4760_v48  ;;  %v5397_v11 = vand.u32 4294901760, %v4906_v9  ;;  %v4929_v12 = vpack.c.bf16 %v645_v37, %v638_v38 }
  0xb8   : >> { %v3767_v59 = vpack.c.bf16 %v647_v50, %v640_v49  ;;  %v5465_v49 = vand.u32 4294901760, %v4807_v51  ;;  %v339_v18 = vmul.f32 %v329_v8, %v329_v8  ;;  %v343_v19 = vmul.f32 %v329_v8, %v326_v55 }
  0xb9   : >> { %3734 = vmatpush3.bf16.msra.mxu1 %v4864_v22  ;;  %v4896_v6 = vpack.c.bf16 %v5459_v63, %v5458_v53  ;;  %v4916_v53 = vsub.f32 %v326_v55, %v4884_v60  ;;  %v4924_v63 = vpack.c.bf16 %v631_v47, %v624_v0  ;;  %v335_v47 = vmul.f32 %v326_v55, %v326_v55 }
  0xba   : >> { %3758 = vmatpush3.bf16.msra.mxu0 %v3755_v62  ;;  %3736 = vmatprep.subr.bf16.mxu1 %v4870_v1  ;;  %v5456_v62 = vand.u32 4294901760, %v4729_v34  ;;  %v440_v37 = vsub.f32 %v4906_v9, %v5397_v11  ;;  %v3775_v11 = vpack.c.bf16 %v4732_v35, %v4729_v34 }
  0xbb   : >> { %3760 = vmatprep.subr.bf16.mxu0 %v3759_v56  ;;  %v5400_v13 = vand.u32 4294901760, %v4916_v53  ;;  %v4956_v17 = vand.u32 4294901760, %v335_v47 }
  0xbc   : >> { %v4890_v27 = vpack.c.bf16 %v5457_v26, %v5456_v62  ;;  %v5462_v62 = vand.u32 4294901760, %v4792_v25  ;;  %v5463_v26 = vand.u32 4294901760, %v4796_v45  ;;  %v441_v14 = vand.u32 4294901760, %v440_v37 }
  0xbd   : >> { %3738 = vmatpush3.bf16.msra.mxu1 %v4870_v1  ;;  %v4969_v34 = vsub.f32 %v335_v47, %v4956_v17 }
  0xbe   : >> { %3762 = vmatpush3.bf16.msra.mxu0 %v3759_v56  ;;  %v4902_v56 = vpack.c.bf16 %v5461_v41, %v5460_v7  ;;  %v4912_v10 = vpack.c.bf16 %v5463_v26, %v5462_v62  ;;  %v5464_v7 = vand.u32 4294901760, %v4799_v46  ;;  %v4926_v41 = vand.u32 4294901760, %v328_v61  ;;  %3415 = vmatprep.mubr.f32.mxu1 %v441_v14 }
  0xbf   : >> { %3764 = vmatprep.subr.bf16.mxu0 %v3763_v42  ;;  %v4931_v62 = vand.u32 4294901760, %v329_v8  ;;  %v334_v26 = vmul.f32 %v4835_v2, %v4835_v2  ;;  %v489_v47 = vand.u32 4294901760, %v4969_v34 }
  0xc0   : >> { %v4922_v50 = vpack.c.bf16 %v5465_v49, %v5464_v7  ;;  %v3771_v7 = vpack.c.bf16 %v4723_v31, %v4720_v30  ;;  %v4939_v0 = vsub.f32 %v328_v61, %v4926_v41  ;;  %v338_v31 = vmul.f32 %v328_v61, %v328_v61 }
  0xc1   : >> { %v4945_v38 = vsub.f32 %v329_v8, %v4931_v62  ;;  %v4951_v30 = vand.u32 4294901760, %v334_v26  ;;  %v490_v8 = vsub.f32 %v4969_v34, %v489_v47 }
  0xc2   : >> { %3766 = vmatpush3.bf16.msra.mxu0 %v3763_v42  ;;  %v450_v42 = vsub.f32 %v4916_v53, %v5400_v13  ;;  %v5402_v49 = vand.u32 4294901760, %v4939_v0  ;;  %v4972_v14 = vand.u32 4294901760, %v338_v31 }
  0xc3   : >> { %3768 = vmatprep.subr.bf16.mxu0 %v3767_v59  ;;  %v5401_v15 = vand.u32 4294901760, %v4945_v38 }
  0xc4   : >> { %v451_v16 = vand.u32 4294901760, %v450_v42  ;;  %v460_v13 = vsub.f32 %v4939_v0, %v5402_v49  ;;  %v342_v42 = vmul.f32 %v328_v61, %v4835_v2  ;;  %v4978_v49 = vand.u32 4294901760, %v339_v18 }
  0xc5   : >> { %v470_v37 = vsub.f32 %v4945_v38, %v5401_v15  ;;  %v3779_v15 = vpack.c.bf16 %v4742_v40, %v4735_v36 }
  0xc6   : >> { %3770 = vmatpush3.bf16.msra.mxu0 %v3767_v59  ;;  %v4962_v59 = vsub.f32 %v334_v26, %v4951_v30  ;;  %3416 = vmatmul.mubr.f32.vlgmr.msra.gmra.mrb[0].mxu1 %v451_v16  ;;  %v461_v35 = vand.u32 4294901760, %v460_v13  ;;  %v4982_v13 = vsub.f32 %v338_v31, %v4972_v14  ;;  %v4989_v61 = vsub.f32 %v339_v18, %v4978_v49 }
  0xc7   : >> { %3772 = vmatprep.subr.bf16.mxu0 %v3771_v7  ;;  %v471_v16 = vand.u32 4294901760, %v470_v37  ;;  %v4995_v36 = vand.u32 4294901760, %v342_v42  ;;  %v5000_v31 = vand.u32 4294901760, %v343_v19  ;;  %v491_v37 = vand.u32 4294901760, %v490_v8 }
  0xc8   : >> { %v479_v26 = vand.u32 4294901760, %v4962_v59  ;;  %3418 = vmatprep.mubr.f32.mxu1 %v461_v35  ;;  %v499_v40 = vand.u32 4294901760, %v4982_v13  ;;  %v509_v18 = vand.u32 4294901760, %v4989_v61 }
  0xc9   : >> { %3463 = vmatmul.mubr.f32.vlgmr.msra.gmra.mrb[0].mxu0 %v4884_v60  ;;  %v5004_v35 = vsub.f32 %v342_v42, %v4995_v36 }
  0xca   : >> { %3774 = vmatpush3.bf16.msra.mxu0 %v3771_v7  ;;  %3465 = vmatprep.mubr.f32.mxu0 %v4926_v41  ;;  %v480_v2 = vsub.f32 %v4962_v59, %v479_v26  ;;  %v3783_v7 = vpack.c.bf16 %v4760_v48, %v4749_v44  ;;  %v510_v44 = vsub.f32 %v4989_v61, %v509_v18 }
  0xcb   : >> { %3776 = vmatprep.subr.bf16.mxu0 %v3775_v11  ;;  %3419 = vmatmul.mubr.f32.gmra.mrb[2].mxu1 %v471_v16  ;;  %v5011_v16 = vsub.f32 %v343_v19, %v5000_v31  ;;  %v519_v48 = vand.u32 4294901760, %v5004_v35 }
  0xcc   : >> { %v481_v55 = vand.u32 4294901760, %v480_v2  ;;  %v3787_v2 = vpack.c.bf16 %v4796_v45, %v4792_v25  ;;  %v3791_v25 = vpack.c.bf16 %v4807_v51, %v4799_v46  ;;  %v5469_v46 = vand.u32 4294901760, %v4945_v38 }
  0xcd   : >> { %3466 = vmatmul.mubr.f32.gmra.mrb[2].mxu0 %v4931_v62  ;;  %v529_v8 = vand.u32 4294901760, %v5011_v16  ;;  %v520_v19 = vsub.f32 %v5004_v35, %v519_v48  ;;  %v4387_v51 = vmov 0.0  }
  0xce   : >> { %3778 = vmatpush3.bf16.msra.mxu0 %v3775_v11  ;;  %3468 = vmatprep.mubr.f32.mxu0 %v4951_v30  ;;  %v500_v11 = vsub.f32 %v4982_v13, %v499_v40 }
  0xcf   : >> { %3780 = vmatprep.subr.bf16.mxu0 %v3779_v15  ;;  %3421 = vmatprep.mubr.f32.mxu1 %v481_v55  ;;  %v511_v55 = vand.u32 4294901760, %v510_v44 }
  0xd0   : >> { %3422 = vmatmul.mubr.f32.gmra.mrb[4].mxu1 %v491_v37  ;;  %v501_v42 = vand.u32 4294901760, %v500_v11  ;;  %v521_v37 = vand.u32 4294901760, %v520_v19  ;;  %v3795_v11 = vpack.c.bf16 %v4842_v52, %v4819_v57  ;;  %v5467_v52 = vand.u32 4294901760, %v4916_v53 }
  0xd1   : >> { %3469 = vmatmul.mubr.f32.gmra.mrb[4].mxu0 %v4956_v17  ;;  %v1406_v57 = vsel %vm1404_vm1, %v4660_v4, 0 }
  0xd2   : >> { %3782 = vmatpush3.bf16.msra.mxu0 %v3779_v15  ;;  %3471 = vmatprep.mubr.f32.mxu0 %v4972_v14  ;;  %v530_v15 = vsub.f32 %v5011_v16, %v529_v8 }
  0xd3   : >> { %3784 = vmatprep.subr.bf16.mxu0 %v3783_v7  ;;  %3424 = vmatprep.mubr.f32.mxu1 %v501_v42 }
  0xd4   : >> { %3425 = vmatmul.mubr.f32.gmra.mrb[6].mxu1 %v511_v55  ;;  %v531_v45 = vand.u32 4294901760, %v530_v15 }
  0xd5   : >> { %3472 = vmatmul.mubr.f32.gmra.mrb[6].mxu0 %v4978_v49  ;;  %3427 = vmatprep.mubr.f32.mxu1 %v521_v37 }
  0xd6   : >> { %3786 = vmatpush3.bf16.msra.mxu0 %v3783_v7  ;;  %3474 = vmatprep.mubr.f32.mxu0 %v4995_v36  ;;  %v3799_v7 = vpack.c.bf16 %v4850_v43, %v4846_v54  ;;  %v5466_v43 = vand.u32 4294901760, %v4906_v9 }
  0xd7   : >> { %3788 = vmatprep.subr.bf16.mxu0 %v3787_v2 }
  0xd8   : >> { %3428 = vmatmul.mubr.f32.gmra.mrb[8].mxu1 %v531_v45 }
  0xd9   : >> { %3475 = vmatmul.mubr.f32.gmra.mrb[8].mxu0 %v5000_v31  ;;  %1479 = vmatprep.mubr.f32.mxu1 %v4387_v51 }
  0xda   : >> { %3790 = vmatpush3.bf16.msra.mxu0 %v3787_v2  ;;  %3509 = vmatprep.mubr.f32.mxu0 %v4906_v9  ;;  %v5468_v9 = vand.u32 4294901760, %v4939_v0 }
  0xdb   : >> { %3792 = vmatprep.subr.bf16.mxu0 %v3791_v25 }
  0xde   : >> { %3794 = vmatpush3.bf16.msra.mxu0 %v3791_v25 }
  0xdf   : >> { %3796 = vmatprep.subr.bf16.mxu0 %v3795_v11 }
  0xe2   : >> { %3798 = vmatpush3.bf16.msra.mxu0 %v3795_v11 }
  0xe3   : >> { %3800 = vmatprep.subr.bf16.mxu0 %v3799_v7 }
  0xe6   : >> { %3802 = vmatpush3.bf16.msra.mxu0 %v3799_v7 }
  0xe7   : >> { %3804 = vmatprep.subr.bf16.mxu0 %v4717_v29 }
  0xe9   : >> { %3510 = vmatmul.mubr.f32.vlgmr.msra.gmra.mrb[0].mxu0 %v4916_v53 }
  0xea   : >> { %3806 = vmatpush3.bf16.msra.mxu0 %v4717_v29  ;;  %3512 = vmatprep.mubr.f32.mxu0 %v4939_v0 }
  0xeb   : >> { %3808 = vmatprep.subr.bf16.mxu0 %v4726_v33 }
  0xed   : >> { %3513 = vmatmul.mubr.f32.gmra.mrb[2].mxu0 %v4945_v38 }
  0xee   : >> { %3810 = vmatpush3.bf16.msra.mxu0 %v4726_v33  ;;  %3515 = vmatprep.mubr.f32.mxu0 %v4962_v59 }
  0xef   : >> { %3812 = vmatprep.subr.bf16.mxu0 %v4739_v39 }
  0xf1   : >> { %3516 = vmatmul.mubr.f32.gmra.mrb[4].mxu0 %v4969_v34 }
  0xf2   : >> { %3814 = vmatpush3.bf16.msra.mxu0 %v4739_v39  ;;  %3518 = vmatprep.mubr.f32.mxu0 %v4982_v13 }
  0xf3   : >> { %3816 = vmatprep.subr.bf16.mxu0 %v4789_v23 }
  0xf5   : >> { %3519 = vmatmul.mubr.f32.gmra.mrb[6].mxu0 %v4989_v61 }
  0xf6   : >> { %3818 = vmatpush3.bf16.msra.mxu0 %v4789_v23  ;;  %3521 = vmatprep.mubr.f32.mxu0 %v5004_v35 }
  0xf7   : >> { %3820 = vmatprep.subr.bf16.mxu0 %v4803_v32 }
  0xf9   : >> { %3522 = vmatmul.mubr.f32.gmra.mrb[8].mxu0 %v5011_v16 }
  0xfa   : >> { %3822 = vmatpush3.bf16.msra.mxu0 %v4803_v32  ;;  %3556 = vmatprep.mubr.f32.mxu0 %v5466_v43 }
  0xfb   : >> { %3824 = vmatprep.subr.bf16.mxu0 %v4855_v28 }
  0xfe   : >> { %3826 = vmatpush3.bf16.msra.mxu0 %v4855_v28 }
  0xff   : >> { %3828 = vmatprep.subr.bf16.mxu0 %v4864_v22 }
 0x102   : >> { %3830 = vmatpush3.bf16.msra.mxu0 %v4864_v22 }
 0x103   : >> { %3832 = vmatprep.subr.bf16.mxu0 %v4870_v1 }
 0x106   : >> { %3834 = vmatpush3.bf16.msra.mxu0 %v4870_v1 }
 0x107   : >> { %3836 = vmatprep.subr.bf16.mxu0 %v4882_v58 }
 0x109   : >> { %3557 = vmatmul.mubr.f32.vlgmr.msra.gmra.mrb[0].mxu0 %v5467_v52 }
 0x10a   : >> { %3838 = vmatpush3.bf16.msra.mxu0 %v4882_v58  ;;  %3559 = vmatprep.mubr.f32.mxu0 %v5468_v9 }
 0x10b   : >> { %3840 = vmatprep.subr.bf16.mxu0 %v4890_v27 }
 0x10d   : >> { %3560 = vmatmul.mubr.f32.gmra.mrb[2].mxu0 %v5469_v46 }
 0x10e   : >> { %3842 = vmatpush3.bf16.msra.mxu0 %v4890_v27  ;;  %3562 = vmatprep.mubr.f32.mxu0 %v479_v26 }
 0x10f   : >> { %3844 = vmatprep.subr.bf16.mxu0 %v4896_v6 }
 0x111   : >> { %3563 = vmatmul.mubr.f32.gmra.mrb[4].mxu0 %v489_v47 }
 0x112   : >> { %3846 = vmatpush3.bf16.msra.mxu0 %v4896_v6  ;;  %3565 = vmatprep.mubr.f32.mxu0 %v499_v40 }
 0x113   : >> { %3848 = vmatprep.subr.bf16.mxu0 %v4902_v56 }
 0x115   : >> { %3566 = vmatmul.mubr.f32.gmra.mrb[6].mxu0 %v509_v18 }
 0x116   : >> { %3850 = vmatpush3.bf16.msra.mxu0 %v4902_v56  ;;  %3568 = vmatprep.mubr.f32.mxu0 %v519_v48 }
 0x117   : >> { %3852 = vmatprep.subr.bf16.mxu0 %v4912_v10 }
 0x119   : >> { %3569 = vmatmul.mubr.f32.gmra.mrb[8].mxu0 %v529_v8 }
 0x11a   : >> { %3854 = vmatpush3.bf16.msra.mxu0 %v4912_v10  ;;  %3603 = vmatprep.mubr.f32.mxu0 %v4853_v24 }
 0x11b   : >> { %3856 = vmatprep.subr.bf16.mxu0 %v4922_v50 }
 0x11e   : >> { %3858 = vmatpush3.bf16.msra.mxu0 %v4922_v50 }
 0x11f   : >> { %3860 = vmatprep.subr.bf16.mxu0 %v4924_v63 }
 0x122   : >> { %3862 = vmatpush3.bf16.msra.mxu0 %v4924_v63 }
 0x123   : >> { %3864 = vmatprep.subr.bf16.mxu0 %v4929_v12 }
 0x126   : >> { %3866 = vmatpush3.bf16.msra.mxu0 %v4929_v12 }
 0x127   : >> { %3868 = vmatprep.subr.bf16.mxu0 %v4717_v29 }
 0x129   : >> { %3604 = vmatmul.mubr.f32.vlgmr.msra.gmra.mrb[0].mxu0 %v4884_v60 }
 0x12a   : >> { %3870 = vmatpush3.bf16.msra.mxu0 %v4717_v29  ;;  %3606 = vmatprep.mubr.f32.mxu0 %v4926_v41 }
 0x12b   : >> { %3872 = vmatprep.subr.bf16.mxu0 %v4726_v33 }
 0x12d   : >> { %3607 = vmatmul.mubr.f32.gmra.mrb[2].mxu0 %v4931_v62 }
 0x12e   : >> { %3874 = vmatpush3.bf16.msra.mxu0 %v4726_v33  ;;  %3609 = vmatprep.mubr.f32.mxu0 %v4951_v30 }
 0x12f   : >> { %3876 = vmatprep.subr.bf16.mxu0 %v4739_v39 }
 0x131   : >> { %3610 = vmatmul.mubr.f32.gmra.mrb[4].mxu0 %v4956_v17 }
 0x132   : >> { %3878 = vmatpush3.bf16.msra.mxu0 %v4739_v39  ;;  %3612 = vmatprep.mubr.f32.mxu0 %v4972_v14 }
 0x133   : >> { %3880 = vmatprep.subr.bf16.mxu0 %v4789_v23 }
 0x135   : >> { %3613 = vmatmul.mubr.f32.gmra.mrb[6].mxu0 %v4978_v49 }
 0x136   : >> { %3882 = vmatpush3.bf16.msra.mxu0 %v4789_v23  ;;  %3615 = vmatprep.mubr.f32.mxu0 %v4995_v36 }
 0x137   : >> { %3884 = vmatprep.subr.bf16.mxu0 %v4803_v32 }
 0x139   : >> { %3616 = vmatmul.mubr.f32.gmra.mrb[8].mxu0 %v5000_v31 }
 0x13a   : >> { %3886 = vmatpush3.bf16.msra.mxu0 %v4803_v32  ;;  %3650 = vmatprep.mubr.f32.mxu0 %v4853_v24  ;;  %v5140_v24 = vand.u32 4294901760, %v1406_v57 }
 0x13b   : >> { %3888 = vmatprep.subr.bf16.mxu0 %v4855_v28 }
 0x13e   : >> { %3890 = vmatpush3.bf16.msra.mxu0 %v4855_v28  ;;  %v1409_v28 = vsel %vm1404_vm1, %v4662_v5, 0 }
 0x13f   : >> { %3892 = vmatprep.subr.bf16.mxu0 %v4864_v22 }
 0x142   : >> { %3894 = vmatpush3.bf16.msra.mxu0 %v4864_v22  ;;  %v5144_v22 = vsub.f32 %v1406_v57, %v5140_v24 }
 0x143   : >> { %3896 = vmatprep.subr.bf16.mxu0 %v4870_v1 }
 0x146   : >> { %3898 = vmatpush3.bf16.msra.mxu0 %v4870_v1  ;;  %v5146_v1 = vand.u32 4294901760, %v1409_v28 }
 0x148   : >> { %v5152_v53 = vsub.f32 %v1409_v28, %v5146_v1 }
 0x149   : >> { %3651 = vmatmul.mubr.f32.vlgmr.msra.gmra.mrb[0].mxu0 %v4884_v60  ;;  %v5149_v60 = vand.u32 4294901760, %v5144_v22 }
 0x14a   : >> { %3653 = vmatprep.mubr.f32.mxu0 %v4926_v41  ;;  %v5159_v59 = vand.u32 4294901760, %v5152_v53 }
 0x14b   : >> { %v1483_v0 = vsub.f32 %v5144_v22, %v5149_v60 }
 0x14c   : >> { %v1494_v42 = vsub.f32 %v5152_v53, %v5159_v59 }
 0x14d   : >> { %3654 = vmatmul.mubr.f32.gmra.mrb[2].mxu0 %v4931_v62  ;;  %v5169_v18 = vand.u32 4294901760, %v1483_v0 }
 0x14e   : >> { %3656 = vmatprep.mubr.f32.mxu0 %v4951_v30 }
 0x151   : >> { %3657 = vmatmul.mubr.f32.gmra.mrb[4].mxu0 %v4956_v17 }
 0x152   : >> { %3659 = vmatprep.mubr.f32.mxu0 %v4972_v14 }
 0x155   : >> { %3660 = vmatmul.mubr.f32.gmra.mrb[6].mxu0 %v4978_v49 }
 0x156   : >> { %3662 = vmatprep.mubr.f32.mxu0 %v4995_v36 }
 0x159   : >> { %3663 = vmatmul.mubr.f32.gmra.mrb[8].mxu0 %v5000_v31 }
 0x199   : >> { %v3417_v6 = vpop.f32.mrb[0].mxu1 }
 0x19a   : >> { %v443_v10 = vpop.f32.mrb[1].mxu1 }
 0x19e   : >> { %v3420_v12 = vpop.f32.mrb[2].mxu1 }
 0x19f   : >> { %v463_v29 = vpop.f32.mrb[3].mxu1 }
 0x1a3   : >> { %v3423_v33 = vpop.f32.mrb[4].mxu1 }
 0x1a4   : >> { %v483_v39 = vpop.f32.mrb[5].mxu1 }
 0x1a7   : >> { %v3426_v23 = vpop.f32.mrb[6].mxu1 }
 0x1a8   : >> { %v503_v32 = vpop.f32.mrb[7].mxu1 }
 0x1ab   : >> { %v5135_v17 = vpop.f32.mrb[8].mxu1 }
 0x1ac   : >> { %v5137_v54 = vpop.f32.mrb[9].mxu1 }
 0x21c   : >> { %v3652_v58 = vpop.f32.mrb[0].mxu0 }
 0x21d   : >> { %v3971_v27 = vadd.f32 %v3652_v58, %v3417_v6  ;;  %v1326_v56 = vpop.f32.mrb[1].mxu0 }
 0x21e   : >> { %v3972_v50 = vadd.f32 %v1326_v56, %v443_v10 }
 0x21f   : >> { %v1417_v63 = vand.u32 4294901760, %v3971_v27 }
 0x220   : >> { %v1413_v41 = vand.u32 4294901760, %v3972_v50  ;;  %v3655_v62 = vpop.f32.mrb[2].mxu0 }
 0x221   : >> { %v5156_v38 = vsub.f32 %v3971_v27, %v1417_v63  ;;  %v3973_v49 = vadd.f32 %v3655_v62, %v3420_v12  ;;  %v1338_v30 = vpop.f32.mrb[3].mxu0  ;;  %v5187_v12 = vand.u32 4294901760, %v1494_v42 }
 0x222   : >> { %v5161_v34 = vpack.c.bf16 %v1417_v63, %v1413_v41  ;;  %v5163_v14 = vsub.f32 %v3972_v50, %v1413_v41  ;;  %v3974_v26 = vadd.f32 %v1338_v30, %v463_v29 }
 0x223   : >> { %v1522_v47 = vand.u32 4294901760, %v5156_v38  ;;  %v1415_v13 = vand.u32 4294901760, %v3973_v49 }
 0x224   : >> { %v1510_v61 = vand.u32 4294901760, %v5163_v14  ;;  %v3909_v36 = vpack.c.bf16 %v5156_v38, %v5163_v14  ;;  %v1411_v40 = vand.u32 4294901760, %v3974_v26  ;;  %v3658_v31 = vpop.f32.mrb[4].mxu0 }
 0x225   : >> { %v1523_v35 = vsub.f32 %v5156_v38, %v1522_v47  ;;  %v5172_v16 = vsub.f32 %v3973_v49, %v1415_v13  ;;  %v3975_v44 = vadd.f32 %v3658_v31, %v3423_v33  ;;  %v1350_v48 = vpop.f32.mrb[5].mxu0 }
 0x226   : >> { %v1511_v2 = vsub.f32 %v5163_v14, %v1510_v61  ;;  %v1503_v8 = vsub.f32 %v3974_v26, %v1411_v40  ;;  %v3976_v55 = vadd.f32 %v1350_v48, %v483_v39  ;;  %v5177_v19 = vpack.c.bf16 %v1415_v13, %v1411_v40 }
 0x227   : >> { %v1524_v15 = vand.u32 4294901760, %v1523_v35  ;;  %v1516_v37 = vand.u32 4294901760, %v5172_v16  ;;  %v1957_v25 = vand.u32 4294901760, %v3975_v44  ;;  %v5180_v45 = vpack.c.bf16 %v1522_v47, %v1510_v61 }
 0x228   : >> { %v1512_v11 = vand.u32 4294901760, %v1511_v2  ;;  %v1504_v7 = vand.u32 4294901760, %v1503_v8  ;;  %v1953_v43 = vand.u32 4294901760, %v3976_v55  ;;  %v3661_v52 = vpop.f32.mrb[6].mxu0  ;;  %3900 = vmatprep.subr.bf16.mxu1 %v5177_v19  ;;  %v3907_v9 = vpack.c.bf16 %v5172_v16, %v1503_v8 }
 0x229   : >> { %v5184_v46 = vsub.f32 %v3975_v44, %v1957_v25  ;;  %v3977_v6 = vadd.f32 %v3661_v52, %v3426_v23  ;;  %v1362_v10 = vpop.f32.mrb[7].mxu0  ;;  %3902 = vmatpush1.bf16.msra.mxu1 %v5161_v34  ;;  %v1517_v29 = vsub.f32 %v5172_v16, %v1516_v37 }
 0x22a   : >> { %v5190_v33 = vpack.c.bf16 %v1957_v25, %v1953_v43  ;;  %v5192_v39 = vsub.f32 %v3976_v55, %v1953_v43  ;;  %v3978_v57 = vadd.f32 %v1362_v10, %v503_v32  ;;  %v1505_v28 = vsub.f32 %v1503_v8, %v1504_v7 }
 0x22b   : >> { %v2062_v58 = vand.u32 4294901760, %v5184_v46  ;;  %v1955_v27 = vand.u32 4294901760, %v3977_v6  ;;  %v1518_v56 = vand.u32 4294901760, %v1517_v29  ;;  %v3905_v50 = vpack.c.bf16 %v1524_v15, %v1512_v11 }
 0x22c   : >> { %v2050_v23 = vand.u32 4294901760, %v5192_v39  ;;  %v3933_v63 = vpack.c.bf16 %v5184_v46, %v5192_v39  ;;  %v1951_v41 = vand.u32 4294901760, %v3978_v57  ;;  %v3664_v62 = vpop.f32.mrb[8].mxu0  ;;  %1485 = vmatmul.mubr.f32.vlgmr.msra.gmra.mrb[10].mxu1 %v5169_v18  ;;  %v1506_v0 = vand.u32 4294901760, %v1505_v28 }
 0x22d   : >> { %v2063_v49 = vsub.f32 %v5184_v46, %v2062_v58  ;;  %v5200_v30 = vsub.f32 %v3977_v6, %v1955_v27  ;;  %v3979_v32 = vadd.f32 %v3664_v62, %v5135_v17  ;;  %v1374_v26 = vpop.f32.mrb[9].mxu0  ;;  %1490 = vmatprep.mubr.f32.mxu1 %v4387_v51  ;;  %v3915_v47 = vpack.c.bf16 %v1516_v37, %v1504_v7 }
 0x22e   : >> { %v2051_v13 = vsub.f32 %v5192_v39, %v2050_v23  ;;  %v5205_v61 = vsub.f32 %v3978_v57, %v1951_v41  ;;  %v3980_v40 = vadd.f32 %v1374_v26, %v5137_v54  ;;  %v3903_v31 = vpack.c.bf16 %v1518_v56, %v1506_v0 }
 0x22f   : >> { %v2064_v35 = vand.u32 4294901760, %v2063_v49  ;;  %v2056_v16 = vand.u32 4294901760, %v5200_v30  ;;  %v2495_v44 = vand.u32 4294901760, %v3979_v32  ;;  %v5209_v48 = vpack.c.bf16 %v1955_v27, %v1951_v41 }
 0x230   : >> { %v2052_v42 = vand.u32 4294901760, %v2051_v13  ;;  %v2044_v17 = vand.u32 4294901760, %v5205_v61  ;;  %v2492_v2 = vand.u32 4294901760, %v3980_v40  ;;  %1496 = vmatmul.mubr.f32.gmra.mrb[12].mxu1 %v5187_v12  ;;  %3904 = vmatprep.subr.bf16.mxu1 %v3903_v31  ;;  %v3931_v8 = vpack.c.bf16 %v5200_v30, %v5205_v61 }
 0x231   : >> { %v2587_v55 = vsub.f32 %v3979_v32, %v2495_v44  ;;  %3906 = vmatpush1.bf16.msra.mxu1 %v3905_v50  ;;  %1586 = vmatprep.mubr.f32.mxu1 %v4387_v51  ;;  %v2057_v54 = vsub.f32 %v5200_v30, %v2056_v16  ;;  %v5217_v15 = vpack.c.bf16 %v2062_v58, %v2050_v23 }
 0x232   : >> { %v5219_v37 = vpack.c.bf16 %v2495_v44, %v2492_v2  ;;  %v2580_v25 = vsub.f32 %v3980_v40, %v2492_v2  ;;  %3908 = vmatprep.subr.bf16.mxu1 %v3907_v9  ;;  %v2045_v11 = vsub.f32 %v5205_v61, %v2044_v17  ;;  %v3929_v7 = vpack.c.bf16 %v2064_v35, %v2052_v42 }
 0x233   : >> { %v2588_v43 = vand.u32 4294901760, %v2587_v55  ;;  %v2058_v52 = vand.u32 4294901760, %v2057_v54  ;;  %v3939_v6 = vpack.c.bf16 %v2056_v16, %v2044_v17 }
 0x234   : >> { %v2581_v10 = vand.u32 4294901760, %v2580_v25  ;;  %1588 = vmatmul.mubr.f32.vlgmr.msra.gmra.mrb[10].mxu1 %v5140_v24  ;;  %v2046_v29 = vand.u32 4294901760, %v2045_v11  ;;  %v5223_v57 = vpack.c.bf16 %v2587_v55, %v2580_v25 }
 0x235   : >> { %3910 = vmatpush1.bf16.msra.mxu1 %v3909_v36  ;;  %1593 = vmatprep.mubr.f32.mxu1 %v4387_v51  ;;  %v2589_v28 = vsub.f32 %v2587_v55, %v2588_v43 }
 0x236   : >> { %3912 = vmatprep.subr.bf16.mxu1 %v5177_v19  ;;  %v3927_v9 = vpack.c.bf16 %v2058_v52, %v2046_v29  ;;  %v2582_v58 = vsub.f32 %v2580_v25, %v2581_v10  ;;  %v5230_v27 = vpack.c.bf16 %v2588_v43, %v2581_v10 }
 0x237   : >> { %v2590_v56 = vand.u32 4294901760, %v2589_v28 }
 0x238   : >> { %1595 = vmatmul.mubr.f32.gmra.mrb[12].mxu1 %v5146_v1  ;;  %v2583_v50 = vand.u32 4294901760, %v2582_v58 }
 0x239   : >> { %1673 = vmatprep.mubr.f32.mxu1 %v4387_v51 }
 0x23a   : >> { %v3951_v23 = vpack.c.bf16 %v2590_v56, %v2583_v50 }
 0x23c   : >> { %1676 = vmatmul.mubr.f32.vlgmr.msra.gmra.mrb[10].mxu1 %v5144_v22 }
 0x23d   : >> { %3914 = vmatpush1.bf16.msra.mxu1 %v5161_v34  ;;  %1681 = vmatprep.mubr.f32.mxu1 %v4387_v51 }
 0x23e   : >> { %3916 = vmatprep.subr.bf16.mxu1 %v3915_v47 }
 0x240   : >> { %1684 = vmatmul.mubr.f32.gmra.mrb[12].mxu1 %v5152_v53 }
 0x241   : >> { %1758 = vmatprep.mubr.f32.mxu1 %v4387_v51 }
 0x244   : >> { %1762 = vmatmul.mubr.f32.vlgmr.msra.gmra.mrb[10].mxu1 %v5149_v60 }
 0x245   : >> { %3918 = vmatpush1.bf16.msra.mxu1 %v5180_v45  ;;  %1767 = vmatprep.mubr.f32.mxu1 %v4387_v51 }
 0x246   : >> { %3920 = vmatprep.subr.bf16.mxu1 %v5177_v19 }
 0x248   : >> { %1771 = vmatmul.mubr.f32.gmra.mrb[12].mxu1 %v5159_v59 }
 0x249   : >> { %1853 = vmatprep.mubr.f32.mxu1 %v4387_v51 }
 0x24c   : >> { %1855 = vmatmul.mubr.f32.vlgmr.msra.gmra.mrb[10].mxu1 %v5140_v24 }
 0x24d   : >> { %3922 = vmatpush1.bf16.msra.mxu1 %v5161_v34  ;;  %1860 = vmatprep.mubr.f32.mxu1 %v4387_v51 }
 0x24e   : >> { %3924 = vmatprep.subr.bf16.mxu1 %v5209_v48 }
 0x250   : >> { %1862 = vmatmul.mubr.f32.gmra.mrb[12].mxu1 %v5146_v1 }
 0x251   : >> { %1936 = vmatprep.mubr.f32.mxu1 %v4387_v51 }
 0x254   : >> { %1938 = vmatmul.mubr.f32.vlgmr.msra.gmra.mrb[10].mxu1 %v5140_v24 }
 0x255   : >> { %3926 = vmatpush1.bf16.msra.mxu1 %v5190_v33  ;;  %1943 = vmatprep.mubr.f32.mxu1 %v4387_v51 }
 0x256   : >> { %3928 = vmatprep.subr.bf16.mxu1 %v3927_v9 }
 0x258   : >> { %1945 = vmatmul.mubr.f32.gmra.mrb[12].mxu1 %v5146_v1 }
 0x259   : >> { %2019 = vmatprep.mubr.f32.mxu1 %v4387_v51 }
 0x25c   : >> { %2025 = vmatmul.mubr.f32.vlgmr.msra.gmra.mrb[14].mxu1 %v5169_v18 }
 0x25d   : >> { %3930 = vmatpush1.bf16.msra.mxu1 %v3929_v7  ;;  %2030 = vmatprep.mubr.f32.mxu1 %v4387_v51 }
 0x25e   : >> { %3932 = vmatprep.subr.bf16.mxu1 %v3931_v8 }
 0x260   : >> { %2036 = vmatmul.mubr.f32.gmra.mrb[16].mxu1 %v5187_v12 }
 0x261   : >> { %2126 = vmatprep.mubr.f32.mxu1 %v4387_v51 }
 0x264   : >> { %2128 = vmatmul.mubr.f32.vlgmr.msra.gmra.mrb[14].mxu1 %v5140_v24 }
 0x265   : >> { %3934 = vmatpush1.bf16.msra.mxu1 %v3933_v63  ;;  %2133 = vmatprep.mubr.f32.mxu1 %v4387_v51 }
 0x266   : >> { %3936 = vmatprep.subr.bf16.mxu1 %v5209_v48 }
 0x268   : >> { %2135 = vmatmul.mubr.f32.gmra.mrb[16].mxu1 %v5146_v1 }
 0x269   : >> { %2213 = vmatprep.mubr.f32.mxu1 %v4387_v51 }
 0x26c   : >> { %2216 = vmatmul.mubr.f32.vlgmr.msra.gmra.mrb[14].mxu1 %v5144_v22 }
 0x26d   : >> { %3938 = vmatpush1.bf16.msra.mxu1 %v5190_v33  ;;  %2221 = vmatprep.mubr.f32.mxu1 %v4387_v51 }
 0x26e   : >> { %3940 = vmatprep.subr.bf16.mxu1 %v3939_v6 }
 0x270   : >> { %2224 = vmatmul.mubr.f32.gmra.mrb[16].mxu1 %v5152_v53 }
 0x271   : >> { %2298 = vmatprep.mubr.f32.mxu1 %v4387_v51 }
 0x274   : >> { %2302 = vmatmul.mubr.f32.vlgmr.msra.gmra.mrb[14].mxu1 %v5149_v60 }
 0x275   : >> { %3942 = vmatpush1.bf16.msra.mxu1 %v5217_v15  ;;  %2307 = vmatprep.mubr.f32.mxu1 %v4387_v51 }
 0x276   : >> { %3944 = vmatprep.subr.bf16.mxu1 %v5209_v48 }
 0x278   : >> { %2311 = vmatmul.mubr.f32.gmra.mrb[16].mxu1 %v5159_v59 }
 0x279   : >> { %2393 = vmatprep.mubr.f32.mxu1 %v4387_v51 }
 0x27c   : >> { %2395 = vmatmul.mubr.f32.vlgmr.msra.gmra.mrb[14].mxu1 %v5140_v24 }
 0x27d   : >> { %3946 = vmatpush1.bf16.msra.mxu1 %v5190_v33  ;;  %2400 = vmatprep.mubr.f32.mxu1 %v4387_v51 }
 0x27e   : >> { %3948 = vmatprep.subr.bf16.mxu1 %v5219_v37 }
 0x280   : >> { %2402 = vmatmul.mubr.f32.gmra.mrb[16].mxu1 %v5146_v1 }
 0x281   : >> { %2476 = vmatprep.mubr.f32.mxu1 %v4387_v51 }
 0x284   : >> { %2478 = vmatmul.mubr.f32.vlgmr.msra.gmra.mrb[14].mxu1 %v5140_v24 }
 0x285   : >> { %3950 = vmatpush3.bf16.msra.mxu1 %v5219_v37  ;;  %2483 = vmatprep.mubr.f32.mxu1 %v4387_v51 }
 0x286   : >> { %3952 = vmatprep.subr.bf16.mxu1 %v3951_v23 }
 0x288   : >> { %2485 = vmatmul.mubr.f32.gmra.mrb[16].mxu1 %v5146_v1 }
 0x289   : >> { %3669 = vmatprep.mubr.f32.mxu1 %v5169_v18 }
 0x28c   : >> { %3670 = vmatmul.mubr.f32.vlgmr.msra.gmra.mrb[18].mxu1 %v5187_v12 }
 0x28d   : >> { %3954 = vmatpush3.bf16.msra.mxu1 %v3951_v23  ;;  %3676 = vmatprep.mubr.f32.mxu1 %v5140_v24 }
 0x28e   : >> { %3956 = vmatprep.subr.bf16.mxu1 %v5223_v57 }
 0x294   : >> { %3677 = vmatmul.mubr.f32.vlgmr.msra.gmra.mrb[18].mxu1 %v5146_v1 }
 0x295   : >> { %3958 = vmatpush3.bf16.msra.mxu1 %v5223_v57  ;;  %3683 = vmatprep.mubr.f32.mxu1 %v5144_v22 }
 0x296   : >> { %3960 = vmatprep.subr.bf16.mxu1 %v5219_v37 }
 0x29c   : >> { %3684 = vmatmul.mubr.f32.vlgmr.msra.gmra.mrb[18].mxu1 %v5152_v53 }
 0x29d   : >> { %3962 = vmatpush3.bf16.msra.mxu1 %v5219_v37  ;;  %3690 = vmatprep.mubr.f32.mxu1 %v5149_v60 }
 0x29e   : >> { %3964 = vmatprep.subr.bf16.mxu1 %v5230_v27 }
 0x2a4   : >> { %3691 = vmatmul.mubr.f32.vlgmr.msra.gmra.mrb[18].mxu1 %v5159_v59 }
 0x2a5   : >> { %3966 = vmatpush3.bf16.msra.mxu1 %v5230_v27  ;;  %3697 = vmatprep.mubr.f32.mxu1 %v5140_v24 }
 0x2a6   : >> { %3968 = vmatprep.subr.bf16.mxu1 %v5219_v37 }
 0x2ac   : >> { %3698 = vmatmul.mubr.f32.vlgmr.msra.gmra.mrb[18].mxu1 %v5146_v1 }
 0x2ad   : >> { %3970 = vmatpush3.bf16.msra.mxu1 %v5219_v37  ;;  %3704 = vmatprep.mubr.f32.mxu1 %v5140_v24 }
 0x2b4   : >> { %3705 = vmatmul.mubr.f32.vlgmr.msra.gmra.mrb[18].mxu1 %v5146_v1 }
 0x327   : >> { %v1939_v51 = vpop.f32.mrb[10].mxu1 }
 0x328   : >> { %v2995_v22 = vmul.f32 %v1939_v51, %v1939_v51  ;;  %v1941_v60 = vpop.f32.mrb[11].mxu1 }
 0x329   : >> { %v2993_v53 = vmul.f32 %v1941_v60, %v1939_v51  ;;  %v2997_v38 = vmul.f32 %v1941_v60, %v1941_v60 }
 0x32b   : >> { %v2999_v59 = vadd.f32 %v2997_v38, %v2995_v22  ;;  %v1946_v34 = vpop.f32.mrb[12].mxu1  ;;  %v3001_v31 = vmul.f32 2.0, %v2993_v53 }
 0x32c   : >> { %v2996_v14 = vmul.f32 %v1946_v34, %v1946_v34  ;;  %v1948_v36 = vpop.f32.mrb[13].mxu1 }
 0x32d   : >> { %v2994_v18 = vmul.f32 %v1948_v36, %v1946_v34  ;;  %v2998_v19 = vmul.f32 %v1948_v36, %v1948_v36  ;;  %v3013_v41 = vadd.f32 0.0001, %v2999_v59  ;;  %v3003_v17 = vadd.f32 0.0001, %v3001_v31 }
 0x32f   : >> { %v3000_v45 = vadd.f32 %v2998_v19, %v2996_v14  ;;  %v3002_v13 = vmul.f32 2.0, %v2994_v18 }
 0x331   : >> { %v3014_v30 = vadd.f32 0.0001, %v3000_v45  ;;  %v3004_v48 = vadd.f32 0.0001, %v3002_v13 }
 0x357   : >> { %v2479_v46 = vpop.f32.mrb[14].mxu1 }
 0x358   : >> { %v2481_v12 = vpop.f32.mrb[15].mxu1 }
 0x359   : >> { %v3015_v33 = vadd.f32 %v2481_v12, %v2479_v46 }
 0x35b   : >> { %v3017_v39 = vsub.f32 %v3015_v33, %v2999_v59  ;;  %v2486_v63 = vpop.f32.mrb[16].mxu1 }
 0x35c   : >> { %v2488_v24 = vpop.f32.mrb[17].mxu1 }
 0x35d   : >> { %v3019_v1 = vadd.f32 0.0009, %v3017_v39  ;;  %v3016_v62 = vadd.f32 %v2488_v24, %v2486_v63 }
 0x35f   : >> { %v3021_v0 = vmul.f32 %v3019_v1, %v3013_v41  ;;  %v3018_v49 = vsub.f32 %v3016_v62, %v3000_v45 }
 0x361   : >> { %v3020_v32 = vadd.f32 0.0009, %v3018_v49 }
 0x363   : >> { %v3022_v26 = vmul.f32 %v3020_v32, %v3014_v30 }
 0x365   : >> { %4168 = vrcp.f32 %v3022_v26 }
 0x366   : >> { %4170 = vrcp.f32 %v3021_v0 }
 0x36f   : >> { %v4169_v55 = vpop.eup %4168 }
 0x370   : >> { %v4171_v15 = vpop.eup %4170 }
 0x387   : >> { %v3706_v47 = vpop.f32.mrb[18].mxu1 }
 0x388   : >> { %v3006_v61 = vsub.f32 %v3706_v47, %v2994_v18  ;;  %v2983_v40 = vpop.f32.mrb[19].mxu1 }
 0x389   : >> { %v3005_v35 = vsub.f32 %v2983_v40, %v2993_v53 }
 0x38a   : >> { %v3008_v16 = vmul.f32 2.0, %v3006_v61 }
 0x38b   : >> { %v3007_v44 = vmul.f32 2.0, %v3005_v35 }
 0x38c   : >> { %v3010_v42 = vadd.f32 0.0009, %v3008_v16 }
 0x38d   : >> { %v3009_v2 = vadd.f32 0.0009, %v3007_v44 }
 0x38e   : >> { %v3012_v8 = vmul.f32 %v3010_v42, %v3004_v48 }
 0x38f   : >> { %v3011_v54 = vmul.f32 %v3009_v2, %v3003_v17 }
 0x390   : >> { %v3026_v37 = vmul.f32 %v4169_v55, %v3012_v8 }
 0x391   : >> { %v3025_v25 = vmul.f32 %v4171_v15, %v3011_v54 }
 0x392   : >> { %v3028_v11 = vmul.f32 %v4658_v3, %v3026_v37 }
 0x393   : >> { %v3027_v7 = vmul.f32 %v4658_v3, %v3025_v25 }
 0x395   : >> { %v3029_v43 = vadd.f32 %v3028_v11, %v3027_v7 }
 0x397   : >> { %3030 = vadd.xlane.f32.xlu0 %v3029_v43 }
 0x424   : >> { %v3031_v52 = vpop.xlane.xlu0 %3030 }
 0x425   : >> { %v3032_v6 = vrot.slane %v3031_v52, 4 }
 0x427   : >> { %v3033_v10 = vadd.f32 %v3032_v6, %v3031_v52 }
 0x429   : >> { %v3034_v29 = vrot.slane %v3033_v10, 2 }
 0x42b   : >> { %v3035_v57 = vadd.f32 %v3034_v29, %v3033_v10 }
 0x42d   : >> { %v3036_v28 = vrot.slane %v3035_v57, 1 }
 0x42f   : >> { %v3037_v9 = vadd.f32 %v3036_v28, %v3035_v57 }
 0x431   : >> { %4074 = vpush %v3037_v9 }
 0x45f   : > { %320 = sbr.rel (!%p318_p9) target bundleno = 155 (0x9b), region = 108 }
 0x462   : >> { %s4075_s13 = spop %4074 }
 0x463   : >> { %s3039_s11 = sadd.f32 %s4374_s22, %s4075_s13  }
 0x465   : >> { %s5470_s22 = smov %s3039_s11  ;;  %v3040_v58 = vstv (%p318_p9), %s3039_s11 }
 0x466   : > { %3041 = vst [vmem:[%s4698_s8] sm:$0xff] %v3040_v58  ;;  %s4294_s22 = scalar_lea.vmem %s4293_s26, 256 }
 0x467   : > { %p4296_p6 = scmp.lt.s32.totalorder %s4294_s22, %s4288_s20 }
 0x469   : > { %p4297_p11 = por %p4296_p6, %p4295_p4 }
 0x46b   : > { %p4298_p12 = pnand %p4297_p11, %p4291_p1 }
 0x46d   : > { %4301 = shalt.err (!%p4298_p12)
}
 0x46e   : > { %s4302_s19 = scalar_lea.hbm %s5322_s9, 128  ;;  %s4306_s14 = scalar_lea.hbm %s5365_s4, 256 }
 0x46f   : > { %p4303_p2 = scmp.ne.s32.totalorder %s5322_s9, %s4302_s19  ;;  %p4307_p7 = scmp.lt.u32.totalorder %s5322_s9, %s5365_s4 }
 0x470   : > { %p4308_p5 = scmp.lt.u32.totalorder %s4306_s14, %s4302_s19  ;;  %p4310_p8 = scmp.lt.u32.totalorder %s4302_s19, %s5322_s9 }
 0x471   : > { %p4304_p13 = pnand %p4303_p2, %p5471_p0 }
 0x472   : > { %p4309_p9 = por %p4308_p5, %p4307_p7 }
 0x473   : > { %p4305_p3 = pneg %p4304_p13 }
 0x474   : > { %p4311_p10 = por %p4310_p8, %p4309_p9 }
 0x476   : > { %p4312_p1 = pnand %p4311_p10, %p4305_p3 }
 0x478   : > { %4315 = shalt.err (!%p4312_p1)
}
 0x479   : > { %4088 = dma.vmem_to_hbm [thread:$0]  (%p5471_p0), %s3057_s29, 128, %s5322_s9, %s3043_s10  }
 0x47a PF: > { %s3068_s30 = sand.u32 1, %s4358_s15   ;;  %p5472_p4 = scmp.ne.s32.totalorder %s5408_s28, 0 }
 0x47b   : > { %p5473_p6 = scmp.ge.s32.totalorder %s4370_s18, 2  ;;  %s3069_s13 = scalar_lea.sflag [#allocation6], %s3068_s30 }
 0x47d   : > { %p4105_p11 = pnand %p5473_p6, %p5472_p4 }
 0x47f   : > { %4353 = dma.done.wait (!%p4105_p11), %s3069_s13, 128  }
 0x480   : > { %4355 = vsyncadd (!%p4105_p11), %s3069_s13, 4294967168  ;;  %p16_p12 = scmp.ge.s32.totalorder %s4439_s21, 4   ;;  %s5474_s15 = smov %s4362_s16 }
 0x481   : > { %s5475_s16 = smov %s4366_s17  ;;  %s5476_s17 = smov %s4451_s24 }
 0x482   : > { %s5477_s18 = smov %s4439_s21  ;;  %18 = sbr.rel (!%p16_p12) target bundleno = 7 (0x7), region = 119 }
 0x489   :  { %3074 = vsyncpa [#allocation5], 1 }
 0x48a   :  { %3076 = vsyncpa [#allocation5 + $0x1], 1 }
 0x48b   :  { %3077 = vsyncpa [#allocation8], 1 }
 0x48c   :  { %3078 = vsyncpa [#allocation6], 1 }
 0x48d   :  { %3080 = vsyncpa [#allocation6 + $0x1], 1 }

</bundles_post_ra>
